<compile_context>
chip_gen: v7x
topology: tpu7x:2x2x1
jax: 0.10.0
libtpu: 0.0.40
codegen_flags: <defaults>
</compile_context>

<pallas_src>
import jax
import jax.numpy as jnp
from jax.experimental import pallas as pl
from jax.experimental.pallas import tpu as pltpu

HIDDEN = 128
IN_DIM = 4
OUT_DIM = 3        # [phi, c, phi_l]
HEAD_PAD = 128     # lane-dense padded head width (zero-filled beyond OUT_DIM)
K_SLOPE = 0.5      # SmoothSigmoid slope (trace-time constant)


def pinn_kernel(scal_ref,                       # SMEM scalars (4,)
                inp_ref,                        # (tile, 4)
                w1_ref, b1_ref, w2_ref, b2_ref, # shared net (resident weights)
                w3_ref, b3_ref, w4_ref, b4_ref,
                wh_ref, bh_ref,                 # fused+padded heads (128,128)/(1,128)
                out_ref):                       # (tile, 128) lane-dense
    f32 = jnp.float32
    h = jnp.tanh(jnp.dot(inp_ref[...], w1_ref[...],
                         preferred_element_type=f32) + b1_ref[...])
    h = jnp.tanh(jnp.dot(h, w2_ref[...], preferred_element_type=f32) + b2_ref[...])
    h = jnp.tanh(jnp.dot(h, w3_ref[...], preferred_element_type=f32) + b3_ref[...])
    h = jnp.tanh(jnp.dot(h, w4_ref[...], preferred_element_type=f32) + b4_ref[...])

    # first linear of the three heads, fused + zero-padded into one (128,128)
    # matmul (same MXU cost as the 3-wide version, lane-dense stores).
    pre = jnp.dot(h, wh_ref[...], preferred_element_type=f32) + bh_ref[...]  # (tile, 128)

    scale  = scal_ref[0]  # SmoothSigmoid learnable scale (init 1.0)
    w_phi2 = scal_ref[1]  # phi_head[2].weight   (init 1.0)
    w_c2   = scal_ref[2]  # c_head[2].weight     (init c_bulk)
    w_pl2  = scal_ref[3]  # phi_l_head[2].weight (init phi_anode)

    col = jax.lax.broadcasted_iota(jnp.int32, pre.shape, 1)
    sig = scale * (1.0 / (1.0 + jnp.exp(-K_SLOPE * pre)))   # SmoothSigmoid (phi col)
    relu = jnp.maximum(pre, 0.0)                            # ReLU (c / phi_l cols)
    act = jnp.where(col == 0, sig, relu)
    wvec = jnp.where(col == 0, w_phi2, jnp.where(col == 1, w_c2, w_pl2))
    # padded columns >= 3 have pre == 0 -> relu == 0 -> output 0 (sliced away).
    out_ref[...] = act * wvec


def phase_field_pinn_forward(x, y, t, params, *, Lx, Ly, t_max, phi_anode, tile=256):
    """x, y, t: (N, 1) float32.  Returns (N, 3) = [phi, c, phi_l]."""
    N = x.shape[0]
    phi_anode_norm = (phi_anode - 0.5) / (0.8 - 0.5)

    # glue: normalization + concat (cheap, done in plain JAX)
    inputs = jnp.concatenate(
        [x / Lx, y / Ly, t / t_max, jnp.full_like(x, phi_anode_norm)],
        axis=1).astype(jnp.float32)

    # ragged batch handling: pad rows up to a tile multiple, slice at the end.
    n_pad = pl.cdiv(N, tile) * tile
    if n_pad != N:
        inputs = jnp.pad(inputs, ((0, n_pad - N), (0, 0)))

    scal = jnp.array([params["sig_scale"],
                      params["w_phi2"],
                      params["w_c2"],
                      params["w_pl2"]], dtype=jnp.float32)

    full = lambda shape: pl.BlockSpec(shape, lambda i: (0, 0))  # resident weights

    out = pl.pallas_call(
        pinn_kernel,
        out_shape=jax.ShapeDtypeStruct((n_pad, HEAD_PAD), jnp.float32),
        grid=(n_pad // tile,),
        in_specs=[
            pl.BlockSpec(memory_space=pltpu.MemorySpace.SMEM),      # scalars
            pl.BlockSpec((tile, IN_DIM), lambda i: (i, 0)),         # inputs
            full((IN_DIM, HIDDEN)), full((1, HIDDEN)),              # layer 1
            full((HIDDEN, HIDDEN)), full((1, HIDDEN)),              # layer 2
            full((HIDDEN, HIDDEN)), full((1, HIDDEN)),              # layer 3
            full((HIDDEN, HIDDEN)), full((1, HIDDEN)),              # layer 4
            full((HIDDEN, HEAD_PAD)), full((1, HEAD_PAD)),          # fused heads
        ],
        out_specs=pl.BlockSpec((tile, HEAD_PAD), lambda i: (i, 0)),
        compiler_params=pltpu.CompilerParams(
            dimension_semantics=("parallel",)),
    )(scal, inputs,
      params["w1"], params["b1"], params["w2"], params["b2"],
      params["w3"], params["b3"], params["w4"], params["b4"],
      params["wh_pad"], params["bh_pad"])

    return out[:N, :OUT_DIM]


def init_params(key, c_bulk, phi_anode):
    """Deterministic init mimicking PyTorch nn.Linear defaults (uniform +-1/sqrt(fan_in))."""
    def linear(key, fan_in, fan_out):
        kw, kb = jax.random.split(key)
        bound = 1.0 / jnp.sqrt(fan_in)
        w = jax.random.uniform(kw, (fan_in, fan_out), jnp.float32, -bound, bound)
        b = jax.random.uniform(kb, (1, fan_out), jnp.float32, -bound, bound)
        return w, b

    keys = jax.random.split(key, 7)
    w1, b1 = linear(keys[0], IN_DIM, HIDDEN)
    w2, b2 = linear(keys[1], HIDDEN, HIDDEN)
    w3, b3 = linear(keys[2], HIDDEN, HIDDEN)
    w4, b4 = linear(keys[3], HIDDEN, HIDDEN)
    wp, bp = linear(keys[4], HIDDEN, 1)   # phi_head[0]
    wc, bc = linear(keys[5], HIDDEN, 1)   # c_head[0]
    wl, bl = linear(keys[6], HIDDEN, 1)   # phi_l_head[0]
    wh = jnp.concatenate([wp, wc, wl], axis=1)        # (128, 3)
    bh = jnp.concatenate([bp, bc, bl], axis=1)        # (1, 3)
    # lane-dense padded versions for the kernel (zero columns beyond OUT_DIM)
    wh_pad = jnp.pad(wh, ((0, 0), (0, HEAD_PAD - OUT_DIM)))   # (128, 128)
    bh_pad = jnp.pad(bh, ((0, 0), (0, HEAD_PAD - OUT_DIM)))   # (1, 128)
    return dict(w1=w1, b1=b1, w2=w2, b2=b2, w3=w3, b3=b3, w4=w4, b4=b4,
                wh=wh, bh=bh, wh_pad=wh_pad, bh_pad=bh_pad,
                sig_scale=jnp.float32(1.0),           # SmoothSigmoid.scale
                w_phi2=jnp.float32(1.0),              # phi_head[2].weight
                w_c2=jnp.float32(c_bulk),             # c_head[2].weight
                w_pl2=jnp.float32(phi_anode))         # phi_l_head[2].weight


def reference_forward(x, y, t, params, *, Lx, Ly, t_max, phi_anode):
    phi_anode_norm = (phi_anode - 0.5) / (0.8 - 0.5)
    inp = jnp.concatenate([x / Lx, y / Ly, t / t_max,
                           jnp.full_like(x, phi_anode_norm)], axis=1)
    h = jnp.tanh(inp @ params["w1"] + params["b1"])
    h = jnp.tanh(h @ params["w2"] + params["b2"])
    h = jnp.tanh(h @ params["w3"] + params["b3"])
    h = jnp.tanh(h @ params["w4"] + params["b4"])
    pre = h @ params["wh"] + params["bh"]
    phi = params["sig_scale"] / (1.0 + jnp.exp(-K_SLOPE * pre[:, 0:1])) * params["w_phi2"]
    c = jnp.maximum(pre[:, 1:2], 0.0) * params["w_c2"]
    phi_l = jnp.maximum(pre[:, 2:3], 0.0) * params["w_pl2"]
    return jnp.concatenate([phi, c, phi_l], axis=1)


if __name__ == "__main__":
    Lx, Ly, t_max, phi_anode = 1.0, 1.0, 1.0, 0.65
    c_bulk = 0.0025

    key = jax.random.PRNGKey(0)
    kp, kx, ky, kt = jax.random.split(key, 4)
    params = init_params(kp, c_bulk, phi_anode)

    # N is deliberately NOT a tile multiple (exercises the cdiv + pad path);
    # it pads to 512 -> grid of 2 parallel steps (both TensorCores on v7x).
    N = 500
    x = jax.random.uniform(kx, (N, 1), jnp.float32) * Lx
    y = jax.random.uniform(ky, (N, 1), jnp.float32) * Ly
    t = jax.random.uniform(kt, (N, 1), jnp.float32) * t_max

    out = phase_field_pinn_forward(x, y, t, params,
                                   Lx=Lx, Ly=Ly, t_max=t_max, phi_anode=phi_anode)
    out = jax.block_until_ready(out)

    ref = reference_forward(x, y, t, params,
                            Lx=Lx, Ly=Ly, t_max=t_max, phi_anode=phi_anode)
    assert out.shape == (N, 3)
    assert jnp.allclose(out, ref, atol=1e-5, rtol=1e-4)
    print("KERNEL_OK")
</pallas_src>

<mosaic_0001>
module attributes {stable_mosaic.version = 11 : i64} {
  func.func @pinn_kernel(%arg0: i32, %arg1: memref<4xf32, #tpu.memory_space<smem>>, %arg2: memref<256x4xf32, #tpu.memory_space<vmem>>, %arg3: memref<4x128xf32, #tpu.memory_space<vmem>>, %arg4: memref<1x128xf32, #tpu.memory_space<vmem>>, %arg5: memref<128x128xf32, #tpu.memory_space<vmem>>, %arg6: memref<1x128xf32, #tpu.memory_space<vmem>>, %arg7: memref<128x128xf32, #tpu.memory_space<vmem>>, %arg8: memref<1x128xf32, #tpu.memory_space<vmem>>, %arg9: memref<128x128xf32, #tpu.memory_space<vmem>>, %arg10: memref<1x128xf32, #tpu.memory_space<vmem>>, %arg11: memref<128x128xf32, #tpu.memory_space<vmem>>, %arg12: memref<1x128xf32, #tpu.memory_space<vmem>>, %arg13: memref<256x128xf32, #tpu.memory_space<vmem>>) attributes {dimension_semantics = [#tpu.dimension_semantics<parallel>], iteration_bounds = array<i64: 2>, scalar_prefetch = 0 : i64, scratch_operands = 0 : i64, tpu.core_type = #tpu.core_type<tc>, window_params = [{transform_indices = @transform_0, window_bounds = array<i64: 4>}, {transform_indices = @transform_1, window_bounds = array<i64: 256, 4>}, {pipeline_mode = #tpu.pipeline_mode<synchronous>, transform_indices = @transform_2, window_bounds = array<i64: 4, 128>}, {pipeline_mode = #tpu.pipeline_mode<synchronous>, transform_indices = @transform_3, window_bounds = array<i64: 1, 128>}, {pipeline_mode = #tpu.pipeline_mode<synchronous>, transform_indices = @transform_4, window_bounds = array<i64: 128, 128>}, {pipeline_mode = #tpu.pipeline_mode<synchronous>, transform_indices = @transform_5, window_bounds = array<i64: 1, 128>}, {pipeline_mode = #tpu.pipeline_mode<synchronous>, transform_indices = @transform_6, window_bounds = array<i64: 128, 128>}, {pipeline_mode = #tpu.pipeline_mode<synchronous>, transform_indices = @transform_7, window_bounds = array<i64: 1, 128>}, {pipeline_mode = #tpu.pipeline_mode<synchronous>, transform_indices = @transform_8, window_bounds = array<i64: 128, 128>}, {pipeline_mode = #tpu.pipeline_mode<synchronous>, transform_indices = @transform_9, window_bounds = array<i64: 1, 128>}, {pipeline_mode = #tpu.pipeline_mode<synchronous>, transform_indices = @transform_10, window_bounds = array<i64: 128, 128>}, {pipeline_mode = #tpu.pipeline_mode<synchronous>, transform_indices = @transform_11, window_bounds = array<i64: 1, 128>}, {transform_indices = @transform_12, window_bounds = array<i64: 256, 128>}]} {
    %c0 = arith.constant 0 : index
    %c0_0 = arith.constant 0 : index
    %0 = vector.load %arg2[%c0, %c0_0] : memref<256x4xf32, #tpu.memory_space<vmem>>, vector<256x4xf32>
    %c0_1 = arith.constant 0 : index
    %c0_2 = arith.constant 0 : index
    %1 = vector.load %arg3[%c0_1, %c0_2] : memref<4x128xf32, #tpu.memory_space<vmem>>, vector<4x128xf32>
    %cst = arith.constant dense<0.000000e+00> : vector<256x128xf32>
    %2 = tpu.matmul %0, %1, %cst {dimension_numbers = #tpu.dot_dimension_numbers<[1], [0], [0], [1], [0, 0, 1, 1], [], []>} : vector<256x4xf32>, vector<4x128xf32>, vector<256x128xf32> -> vector<256x128xf32>
    %c0_3 = arith.constant 0 : index
    %c0_4 = arith.constant 0 : index
    %3 = vector.load %arg4[%c0_3, %c0_4] : memref<1x128xf32, #tpu.memory_space<vmem>>, vector<1x128xf32>
    %4 = vector.broadcast %3 : vector<1x128xf32> to vector<256x128xf32>
    %5 = arith.addf %2, %4 : vector<256x128xf32>
    %6 = math.tanh %5 : vector<256x128xf32>
    %c0_5 = arith.constant 0 : index
    %c0_6 = arith.constant 0 : index
    %7 = vector.load %arg5[%c0_5, %c0_6] : memref<128x128xf32, #tpu.memory_space<vmem>>, vector<128x128xf32>
    %cst_7 = arith.constant dense<0.000000e+00> : vector<256x128xf32>
    %8 = tpu.matmul %6, %7, %cst_7 {dimension_numbers = #tpu.dot_dimension_numbers<[1], [0], [0], [1], [0, 0, 1, 1], [], []>} : vector<256x128xf32>, vector<128x128xf32>, vector<256x128xf32> -> vector<256x128xf32>
    %c0_8 = arith.constant 0 : index
    %c0_9 = arith.constant 0 : index
    %9 = vector.load %arg6[%c0_8, %c0_9] : memref<1x128xf32, #tpu.memory_space<vmem>>, vector<1x128xf32>
    %10 = vector.broadcast %9 : vector<1x128xf32> to vector<256x128xf32>
    %11 = arith.addf %8, %10 : vector<256x128xf32>
    %12 = math.tanh %11 : vector<256x128xf32>
    %c0_10 = arith.constant 0 : index
    %c0_11 = arith.constant 0 : index
    %13 = vector.load %arg7[%c0_10, %c0_11] : memref<128x128xf32, #tpu.memory_space<vmem>>, vector<128x128xf32>
    %cst_12 = arith.constant dense<0.000000e+00> : vector<256x128xf32>
    %14 = tpu.matmul %12, %13, %cst_12 {dimension_numbers = #tpu.dot_dimension_numbers<[1], [0], [0], [1], [0, 0, 1, 1], [], []>} : vector<256x128xf32>, vector<128x128xf32>, vector<256x128xf32> -> vector<256x128xf32>
    %c0_13 = arith.constant 0 : index
    %c0_14 = arith.constant 0 : index
    %15 = vector.load %arg8[%c0_13, %c0_14] : memref<1x128xf32, #tpu.memory_space<vmem>>, vector<1x128xf32>
    %16 = vector.broadcast %15 : vector<1x128xf32> to vector<256x128xf32>
    %17 = arith.addf %14, %16 : vector<256x128xf32>
    %18 = math.tanh %17 : vector<256x128xf32>
    %c0_15 = arith.constant 0 : index
    %c0_16 = arith.constant 0 : index
    %19 = vector.load %arg9[%c0_15, %c0_16] : memref<128x128xf32, #tpu.memory_space<vmem>>, vector<128x128xf32>
    %cst_17 = arith.constant dense<0.000000e+00> : vector<256x128xf32>
    %20 = tpu.matmul %18, %19, %cst_17 {dimension_numbers = #tpu.dot_dimension_numbers<[1], [0], [0], [1], [0, 0, 1, 1], [], []>} : vector<256x128xf32>, vector<128x128xf32>, vector<256x128xf32> -> vector<256x128xf32>
    %c0_18 = arith.constant 0 : index
    %c0_19 = arith.constant 0 : index
    %21 = vector.load %arg10[%c0_18, %c0_19] : memref<1x128xf32, #tpu.memory_space<vmem>>, vector<1x128xf32>
    %22 = vector.broadcast %21 : vector<1x128xf32> to vector<256x128xf32>
    %23 = arith.addf %20, %22 : vector<256x128xf32>
    %24 = math.tanh %23 : vector<256x128xf32>
    %c0_20 = arith.constant 0 : index
    %c0_21 = arith.constant 0 : index
    %25 = vector.load %arg11[%c0_20, %c0_21] : memref<128x128xf32, #tpu.memory_space<vmem>>, vector<128x128xf32>
    %cst_22 = arith.constant dense<0.000000e+00> : vector<256x128xf32>
    %26 = tpu.matmul %24, %25, %cst_22 {dimension_numbers = #tpu.dot_dimension_numbers<[1], [0], [0], [1], [0, 0, 1, 1], [], []>} : vector<256x128xf32>, vector<128x128xf32>, vector<256x128xf32> -> vector<256x128xf32>
    %c0_23 = arith.constant 0 : index
    %c0_24 = arith.constant 0 : index
    %27 = vector.load %arg12[%c0_23, %c0_24] : memref<1x128xf32, #tpu.memory_space<vmem>>, vector<1x128xf32>
    %28 = vector.broadcast %27 : vector<1x128xf32> to vector<256x128xf32>
    %29 = arith.addf %26, %28 : vector<256x128xf32>
    %c0_25 = arith.constant 0 : index
    %30 = memref.load %arg1[%c0_25] : memref<4xf32, #tpu.memory_space<smem>>
    %c1 = arith.constant 1 : index
    %31 = memref.load %arg1[%c1] : memref<4xf32, #tpu.memory_space<smem>>
    %c2 = arith.constant 2 : index
    %32 = memref.load %arg1[%c2] : memref<4xf32, #tpu.memory_space<smem>>
    %c3 = arith.constant 3 : index
    %33 = memref.load %arg1[%c3] : memref<4xf32, #tpu.memory_space<smem>>
    %34 = tpu.iota {dimensions = array<i32: 1>} : vector<256x128xi32>
    %cst_26 = arith.constant -5.000000e-01 : f32
    %35 = vector.broadcast %cst_26 : f32 to vector<256x128xf32>
    %36 = arith.mulf %35, %29 : vector<256x128xf32>
    %37 = math.exp %36 : vector<256x128xf32>
    %cst_27 = arith.constant 1.000000e+00 : f32
    %38 = vector.broadcast %cst_27 : f32 to vector<256x128xf32>
    %39 = arith.addf %38, %37 : vector<256x128xf32>
    %cst_28 = arith.constant 1.000000e+00 : f32
    %40 = vector.broadcast %cst_28 : f32 to vector<256x128xf32>
    %41 = arith.divf %40, %39 : vector<256x128xf32>
    %42 = vector.broadcast %30 : f32 to vector<256x128xf32>
    %43 = arith.mulf %42, %41 : vector<256x128xf32>
    %cst_29 = arith.constant 0.000000e+00 : f32
    %44 = vector.broadcast %cst_29 : f32 to vector<256x128xf32>
    %45 = arith.maximumf %29, %44 : vector<256x128xf32>
    %c0_i32 = arith.constant 0 : i32
    %46 = vector.broadcast %c0_i32 : i32 to vector<256x128xi32>
    %47 = arith.cmpi eq, %34, %46 : vector<256x128xi32>
    %48 = arith.select %47, %43, %45 : vector<256x128xi1>, vector<256x128xf32>
    %c0_i32_30 = arith.constant 0 : i32
    %49 = vector.broadcast %c0_i32_30 : i32 to vector<256x128xi32>
    %50 = arith.cmpi eq, %34, %49 : vector<256x128xi32>
    %c1_i32 = arith.constant 1 : i32
    %51 = vector.broadcast %c1_i32 : i32 to vector<256x128xi32>
    %52 = arith.cmpi eq, %34, %51 : vector<256x128xi32>
    %53 = vector.broadcast %32 : f32 to vector<256x128xf32>
    %54 = vector.broadcast %33 : f32 to vector<256x128xf32>
    %55 = arith.select %52, %53, %54 : vector<256x128xi1>, vector<256x128xf32>
    %56 = vector.broadcast %31 : f32 to vector<256x128xf32>
    %57 = arith.select %50, %56, %55 : vector<256x128xi1>, vector<256x128xf32>
    %58 = arith.mulf %48, %57 : vector<256x128xf32>
    %c0_31 = arith.constant 0 : index
    %c0_32 = arith.constant 0 : index
    %59 = vector.load %arg13[%c0_31, %c0_32] : memref<256x128xf32, #tpu.memory_space<vmem>>, vector<256x128xf32>
    tpu.vector_store %arg13[%c0_31, %c0_32], %58 {strides = array<i32>} : memref<256x128xf32, #tpu.memory_space<vmem>>, vector<256x128xf32>,
    return
  }
  func.func @transform_0(%arg0: i32) -> i32 {
    %c0_i32 = arith.constant 0 : i32
    %c0_i32_0 = arith.constant 0 : i32
    return %c0_i32 : i32
  }
  func.func @transform_1(%arg0: i32) -> (i32, i32) {
    %c0_i32 = arith.constant 0 : i32
    %c0_i32_0 = arith.constant 0 : i32
    return %arg0, %c0_i32 : i32, i32
  }
  func.func @transform_2(%arg0: i32) -> (i32, i32) {
    %c0_i32 = arith.constant 0 : i32
    %c0_i32_0 = arith.constant 0 : i32
    %c0_i32_1 = arith.constant 0 : i32
    return %c0_i32, %c0_i32_0 : i32, i32
  }
  func.func @transform_3(%arg0: i32) -> (i32, i32) {
    %c0_i32 = arith.constant 0 : i32
    %c0_i32_0 = arith.constant 0 : i32
    %c0_i32_1 = arith.constant 0 : i32
    return %c0_i32, %c0_i32_0 : i32, i32
  }
  func.func @transform_4(%arg0: i32) -> (i32, i32) {
    %c0_i32 = arith.constant 0 : i32
    %c0_i32_0 = arith.constant 0 : i32
    %c0_i32_1 = arith.constant 0 : i32
    return %c0_i32, %c0_i32_0 : i32, i32
  }
  func.func @transform_5(%arg0: i32) -> (i32, i32) {
    %c0_i32 = arith.constant 0 : i32
    %c0_i32_0 = arith.constant 0 : i32
    %c0_i32_1 = arith.constant 0 : i32
    return %c0_i32, %c0_i32_0 : i32, i32
  }
  func.func @transform_6(%arg0: i32) -> (i32, i32) {
    %c0_i32 = arith.constant 0 : i32
    %c0_i32_0 = arith.constant 0 : i32
    %c0_i32_1 = arith.constant 0 : i32
    return %c0_i32, %c0_i32_0 : i32, i32
  }
  func.func @transform_7(%arg0: i32) -> (i32, i32) {
    %c0_i32 = arith.constant 0 : i32
    %c0_i32_0 = arith.constant 0 : i32
    %c0_i32_1 = arith.constant 0 : i32
    return %c0_i32, %c0_i32_0 : i32, i32
  }
  func.func @transform_8(%arg0: i32) -> (i32, i32) {
    %c0_i32 = arith.constant 0 : i32
    %c0_i32_0 = arith.constant 0 : i32
    %c0_i32_1 = arith.constant 0 : i32
    return %c0_i32, %c0_i32_0 : i32, i32
  }
  func.func @transform_9(%arg0: i32) -> (i32, i32) {
    %c0_i32 = arith.constant 0 : i32
    %c0_i32_0 = arith.constant 0 : i32
    %c0_i32_1 = arith.constant 0 : i32
    return %c0_i32, %c0_i32_0 : i32, i32
  }
  func.func @transform_10(%arg0: i32) -> (i32, i32) {
    %c0_i32 = arith.constant 0 : i32
    %c0_i32_0 = arith.constant 0 : i32
    %c0_i32_1 = arith.constant 0 : i32
    return %c0_i32, %c0_i32_0 : i32, i32
  }
  func.func @transform_11(%arg0: i32) -> (i32, i32) {
    %c0_i32 = arith.constant 0 : i32
    %c0_i32_0 = arith.constant 0 : i32
    %c0_i32_1 = arith.constant 0 : i32
    return %c0_i32, %c0_i32_0 : i32, i32
  }
  func.func @transform_12(%arg0: i32) -> (i32, i32) {
    %c0_i32 = arith.constant 0 : i32
    %c0_i32_0 = arith.constant 0 : i32
    return %arg0, %c0_i32 : i32, i32
  }
}

</mosaic_0001>

<bundles_post_ra>
// kernel: tpu_custom_call.1
= control target key start
LH: loop header
LB: loop body
LE: loop exit
PB: predicated region body
PF: predicated region fallthrough
CT: control target
= control target key end

     0   :  { %s4650_s0 = inlined_call_operand.vmem [shape: f32[4], index: 0, kind: input, shape index: {}]   ;;  %s4651_s1 = inlined_call_operand.vmem [shape: f32[512,4], index: 1, kind: input, shape index: {}]   ;;  %s4652_s2 = inlined_call_operand.vmem [shape: f32[4,128], index: 2, kind: input, shape index: {}]   ;;  %s4653_s3 = inlined_call_operand.vmem [shape: f32[1,128], index: 3, kind: input, shape index: {}]   ;;  %s4654_s4 = inlined_call_operand.vmem [shape: f32[128,128], index: 4, kind: input, shape index: {}]   ;;  %s4655_s5 = inlined_call_operand.vmem [shape: f32[1,128], index: 5, kind: input, shape index: {}]   ;;  %s4656_s6 = inlined_call_operand.vmem [shape: f32[128,128], index: 6, kind: input, shape index: {}]   ;;  %s4657_s7 = inlined_call_operand.vmem [shape: f32[1,128], index: 7, kind: input, shape index: {}]   ;;  %s4658_s8 = inlined_call_operand.vmem [shape: f32[128,128], index: 8, kind: input, shape index: {}]   ;;  %s4659_s9 = inlined_call_operand.vmem [shape: f32[1,128], index: 9, kind: input, shape index: {}]   ;;  %s4660_s10 = inlined_call_operand.vmem [shape: f32[128,128], index: 10, kind: input, shape index: {}]   ;;  %s4661_s11 = inlined_call_operand.vmem [shape: f32[1,128], index: 11, kind: input, shape index: {}]   ;;  %s4662_s12 = inlined_call_operand.hbm [shape: f32[512,128], index: 12, kind: output, shape index: {}]  }
   0x1   :  { %4663 = sst [smem:[#allocation8_spill]] %s4650_s0 }
   0x2   :  { %17 = vsyncpa [#allocation4], 0 }
   0x3   :  { %18 = vsyncpa [#allocation3], 0 }
   0x4   :  { %20 = vsyncpa [#allocation3 + $0x1], 0  ;;  %s3738_s21 = smov 0   ;;  %s3740_s22 = smov 0  }
   0x5   :  { %s3742_s23 = smov 0   ;;  %s3744_s24 = smov 0  }
   0x6 LB: > { %s3759_s25 = sadd.s32 4294967295, %s3667_s24   ;;  %s2369_s26 = sadd.s32 4294967294, %s3667_s24   ;;  %s3667_s24 = sphi %s3744_s24, %s4671_s24   ;;  %s3663_s23 = sphi %s3742_s23, %s4670_s23   ;;  %s3659_s22 = sphi %s3740_s22, %s4669_s22   ;;  %s3655_s21 = sphi %s3738_s21, %s4668_s21  }
   0x7   : > { %s3763_s27 = sadd.s32 1, %s3667_s24   ;;  %s290_s28 = sadd.s32 1, %s3663_s23 }
   0x8   : > { %s287_s29 = ssub.s32 %s3667_s24, %s3763_s27  ;;  %p300_p0 = scmp.ne.s32.totalorder %s3663_s23, %s3659_s22 }
   0x9   : > { %p288_p1 = scmp.eq.s32.totalorder %s287_s29, 0  ;;  %p301_p2 = scmp.eq.s32.totalorder %s3759_s25, 1 }
   0xa   : > { %p306_p3 = scmp.ne.s32.totalorder %s3659_s22, %s3655_s21  ;;  %p307_p4 = scmp.eq.s32.totalorder %s2369_s26, 1 }
   0xb   : > { %s3774_s30 = scalar_select %p288_p1, %s3663_s23, %s290_s28  }
   0xc   : > { %p3776_p5 = por %p301_p2, %p300_p0  ;;  %p3780_p6 = por %p307_p4, %p306_p3 }
   0xd   : > { %p2370_p7 = scmp.ge.s32.totalorder %s3667_s24, 1  ;;  %p314_p8 = scmp.lt.s32.totalorder %s3667_s24, 3 }
   0xe   : > { %p3164_p9 = scmp.eq.s32.totalorder %s3759_s25, 0  ;;  %s4667_s0 = sld [smem:[#allocation8_spill]] }
   0xf   : > { %p3787_p10 = pnand %p2370_p7, %p314_p8 }
  0x11   : > { %p3156_p11 = pneg %p3787_p10 }
  0x13   : > { %p3157_p12 = pnand %p3164_p9, %p3156_p11 }
  0x14   : > { %s327_s18 = sshll.u32 %s4667_s0, 4  ;;  %s328_s18 = int_to_ptr.vmem [resolvable:$true] %s327_s18 }
  0x15   : > { %s3586_s19 = scalar_lea.vmem %s328_s18, 16  ;;  %p3588_p0 = pneg %p3157_p12 }
  0x16   : > { %p3587_p13 = scmp.ne.s32.totalorder %s328_s18, %s3586_s19  ;;  %p3594_p3 = scmp.lt.s32.totalorder %s328_s18, %s328_s18 }
  0x17   : > { %p3595_p4 = scmp.lt.s32.totalorder %s3586_s19, %s3586_s19 }
  0x18   : > { %p3589_p1 = pnand %p3588_p0, %p3587_p13 }
  0x19   : > { %p3596_p7 = por %p3595_p4, %p3594_p3 }
  0x1a   : > { %p3590_p2 = pneg %p3589_p1 }
  0x1c   : > { %p3597_p8 = pnand %p3596_p7, %p3590_p2 }
  0x1e   : > { %3600 = shalt.err (!%p3597_p8)
}
  0x1f   : > { %s3669_s20 = smov [#allocation2]   ;;  %379 = sbr.rel (%p3787_p10) target bundleno = 1289 (0x509), region = 68 }
  0x20   : > { %3159 = dma.vmem_to_smem (!%p3157_p12), %s328_s18, 16, %s3669_s20, [#allocation4]  }
  0x26   : > { %3646 = dma.done.wait (%p3164_p9), [#allocation4], 16  }
  0x27   : > { %3648 = vsyncadd (%p3164_p9), [#allocation4], 4294967280 }
  0x28   : > { %385 = sfence }
  0x29   : > { %v461_v0 = vld [vmem:[%s4652_s2] sm:$0xf]  ;;  %vm566_vm0 = vcmask 1043456   ;;  %s2376_s29 = sshll.u32 %s3759_s25, 5  ;;  %v828_v2 = vld [vmem:[%s4654_s4 + $0x8] sm:$0xff]  ;;  %vm469_vm1 = vcmask 31744  }
  0x2a   : > { %v827_v1 = vld [vmem:[%s4654_s4] sm:$0xff]  ;;  %2650 = vmatprep.subr.msk.mxu0 %vm566_vm0, %v461_v0  ;;  %p423_p10 = scmp.lt.s32.totalorder %s2376_s29, 63  ;;  %3148 = vmatprep.subr.msk.mxu1 %vm566_vm0, %v461_v0  ;;  %v829_v7 = vld [vmem:[%s4654_s4 + $0x10] sm:$0xff]  ;;  %v830_v8 = vld [vmem:[%s4654_s4 + $0x18] sm:$0xff]  ;;  %s4276_s16 = sld [smem:[#allocation2 + $0x1]] }
  0x2b   : > { %2651 = vmatpush3.msk.msra.mxu0 %vm566_vm0, %v461_v0  ;;  %3149 = vmatpush3.msk.msra.mxu1 %vm566_vm0, %v461_v0  ;;  %v3020_v3 = vpack.c.bf16 %v828_v2, %v827_v1  ;;  %v3024_v13 = vpack.c.bf16 %v830_v8, %v829_v7  ;;  %v831_v15 = vld [vmem:[%s4654_s4 + $0x20] sm:$0xff]  ;;  %v832_v16 = vld [vmem:[%s4654_s4 + $0x28] sm:$0xff]  ;;  %v833_v22 = vld [vmem:[%s4654_s4 + $0x30] sm:$0xff]  ;;  %s4285_s17 = sld [smem:[#allocation2]]  ;;  %s419_s15 = sand.u32 1, %s3659_s22  }
  0x2c   : > { %s4673_s29 = smov (!%p423_p10, %s2376_s29), 63  ;;  %v3028_v21 = vpack.c.bf16 %v832_v16, %v831_v15  ;;  %v834_v23 = vld [vmem:[%s4654_s4 + $0x38] sm:$0xff]  ;;  %v835_v29 = vld [vmem:[%s4654_s4 + $0x40] sm:$0xff]  ;;  %v836_v30 = vld [vmem:[%s4654_s4 + $0x48] sm:$0xff]  ;;  %s4336_s18 = sshll.u32 %s419_s15, 8 }
  0x2d   : > { %3021 = vmatprep.subr.bf16.mxu1 %v3020_v3  ;;  %s2377_s19 = sshll.u32 %s4673_s29, 3  ;;  %v3032_v28 = vpack.c.bf16 %v834_v23, %v833_v22  ;;  %v3036_v35 = vpack.c.bf16 %v836_v30, %v835_v29  ;;  %v837_v48 = vld [vmem:[%s4654_s4 + $0x50] sm:$0xff]  ;;  %v838_v49 = vld [vmem:[%s4654_s4 + $0x58] sm:$0xff]  ;;  %v839_v51 = vld [vmem:[%s4654_s4 + $0x60] sm:$0xff]  ;;  %s4264_s29 = sld [smem:[#allocation2 + $0x3]] }
  0x2e   : > { %s3817_s28 = scalar_lea.vmem %s4651_s1, %s2377_s19  ;;  %v3040_v50 = vpack.c.bf16 %v838_v49, %v837_v48  ;;  %v840_v52 = vld [vmem:[%s4654_s4 + $0x68] sm:$0xff]  ;;  %v841_v54 = vld [vmem:[%s4654_s4 + $0x70] sm:$0xff]  ;;  %v842_v55 = vld [vmem:[%s4654_s4 + $0x78] sm:$0xff]  ;;  %s4358_s0 = scalar_lea.vmem [#allocation5], %s4336_s18 }
  0x2f   : > { %v429_v4 = vld [vmem:[%s3817_s28] sm:$0xff]  ;;  %v430_v5 = vld [vmem:[%s3817_s28 + $0x8] sm:$0xff]  ;;  %v431_v6 = vld [vmem:[%s3817_s28 + $0x10] sm:$0xff]  ;;  %v3044_v53 = vpack.c.bf16 %v840_v52, %v839_v51  ;;  %v3048_v56 = vpack.c.bf16 %v842_v55, %v841_v54  ;;  %s2424_s19 = sshll.u32 %s3759_s25, 12  ;;  %s2295_s20 = sshll.u32 %s4358_s0, 4  ;;  %s4602_s20 = int_to_ptr.vmem [resolvable:$true] %s2295_s20 }
  0x30   : > { %2652 = vmatprep.mubr.msk.f32.mxu0 %vm469_vm1, %v429_v4  ;;  %v432_v9 = vld [vmem:[%s3817_s28 + $0x18] sm:$0xff]  ;;  %v433_v10 = vld [vmem:[%s3817_s28 + $0x20] sm:$0xff]  ;;  %v446_v12 = vld [vmem:[%s3817_s28 + $0x88] sm:$0xff] }
  0x31   : > { %2653 = vmatmul.mubr.msk.f32.vlgmr.msra.gmra.mrb[0].mxu0 %vm469_vm1, %v430_v5  ;;  %v445_v11 = vld [vmem:[%s3817_s28 + $0x80] sm:$0xff]  ;;  %v447_v14 = vld [vmem:[%s3817_s28 + $0x90] sm:$0xff]  ;;  %v434_v17 = vld [vmem:[%s3817_s28 + $0x28] sm:$0xff] }
  0x32   : > { %2655 = vmatprep.mubr.msk.f32.mxu0 %vm469_vm1, %v431_v6  ;;  %2676 = vmatprep.mubr.msk.f32.mxu1 %vm469_vm1, %v445_v11  ;;  %v435_v18 = vld [vmem:[%s3817_s28 + $0x30] sm:$0xff]  ;;  %v448_v19 = vld [vmem:[%s3817_s28 + $0x98] sm:$0xff]  ;;  %v449_v20 = vld [vmem:[%s3817_s28 + $0xa0] sm:$0xff] }
  0x33   : > { %2677 = vmatmul.mubr.msk.f32.vlgmr.msra.gmra.mrb[0].mxu1 %vm469_vm1, %v446_v12  ;;  %v436_v24 = vld [vmem:[%s3817_s28 + $0x38] sm:$0xff]  ;;  %v437_v25 = vld [vmem:[%s3817_s28 + $0x40] sm:$0xff]  ;;  %v450_v26 = vld [vmem:[%s3817_s28 + $0xa8] sm:$0xff] }
  0x34   : > { %2679 = vmatprep.mubr.msk.f32.mxu1 %vm469_vm1, %v447_v14  ;;  %3023 = vmatpush3.bf16.msra.mxu1 %v3020_v3  ;;  %v451_v27 = vld [vmem:[%s3817_s28 + $0xb0] sm:$0xff]  ;;  %v438_v31 = vld [vmem:[%s3817_s28 + $0x48] sm:$0xff]  ;;  %v452_v33 = vld [vmem:[%s3817_s28 + $0xb8] sm:$0xff] }
  0x35   : > { %2656 = vmatmul.mubr.msk.f32.gmra.mrb[2].mxu0 %vm469_vm1, %v432_v9  ;;  %3025 = vmatprep.subr.bf16.mxu1 %v3024_v13  ;;  %v439_v32 = vld [vmem:[%s3817_s28 + $0x50] sm:$0xff]  ;;  %v453_v34 = vld [vmem:[%s3817_s28 + $0xc0] sm:$0xff]  ;;  %v440_v36 = vld [vmem:[%s3817_s28 + $0x58] sm:$0xff] }
  0x36   : > { %2658 = vmatprep.mubr.msk.f32.mxu0 %vm469_vm1, %v433_v10  ;;  %v441_v37 = vld [vmem:[%s3817_s28 + $0x60] sm:$0xff]  ;;  %v454_v38 = vld [vmem:[%s3817_s28 + $0xc8] sm:$0xff]  ;;  %v455_v39 = vld [vmem:[%s3817_s28 + $0xd0] sm:$0xff] }
  0x37   : > { %2680 = vmatmul.mubr.msk.f32.gmra.mrb[2].mxu1 %vm469_vm1, %v448_v19  ;;  %v442_v40 = vld [vmem:[%s3817_s28 + $0x68] sm:$0xff]  ;;  %v443_v41 = vld [vmem:[%s3817_s28 + $0x70] sm:$0xff]  ;;  %v456_v42 = vld [vmem:[%s3817_s28 + $0xd8] sm:$0xff] }
  0x38   : > { %2682 = vmatprep.mubr.msk.f32.mxu1 %vm469_vm1, %v449_v20  ;;  %3027 = vmatpush3.bf16.msra.mxu1 %v3024_v13  ;;  %v457_v43 = vld [vmem:[%s3817_s28 + $0xe0] sm:$0xff]  ;;  %v444_v44 = vld [vmem:[%s3817_s28 + $0x78] sm:$0xff]  ;;  %v458_v45 = vld [vmem:[%s3817_s28 + $0xe8] sm:$0xff] }
  0x39   : > { %2659 = vmatmul.mubr.msk.f32.gmra.mrb[4].mxu0 %vm469_vm1, %v434_v17  ;;  %3029 = vmatprep.subr.bf16.mxu1 %v3028_v21  ;;  %v459_v46 = vld [vmem:[%s3817_s28 + $0xf0] sm:$0xff]  ;;  %v460_v47 = vld [vmem:[%s3817_s28 + $0xf8] sm:$0xff]  ;;  %v1107_v57 = vld [vmem:[%s4656_s6] sm:$0xff]  ;;  %s4261_s28 = sld [smem:[#allocation2 + $0x2]] }
  0x3a   : > { %2661 = vmatprep.mubr.msk.f32.mxu0 %vm469_vm1, %v435_v18  ;;  %v1108_v58 = vld [vmem:[%s4656_s6 + $0x8] sm:$0xff]  ;;  %v1109_v59 = vld [vmem:[%s4656_s6 + $0x10] sm:$0xff]  ;;  %v1110_v61 = vld [vmem:[%s4656_s6 + $0x18] sm:$0xff] }
  0x3b   : > { %2683 = vmatmul.mubr.msk.f32.gmra.mrb[4].mxu1 %vm469_vm1, %v450_v26  ;;  %v3052_v60 = vpack.c.bf16 %v1108_v58, %v1107_v57  ;;  %v3056_v62 = vpack.c.bf16 %v1110_v61, %v1109_v59  ;;  %v1111_v63 = vld [vmem:[%s4656_s6 + $0x20] sm:$0xff]  ;;  %v1112_v0 = vld [vmem:[%s4656_s6 + $0x28] sm:$0xff]  ;;  %v1113_v2 = vld [vmem:[%s4656_s6 + $0x30] sm:$0xff] }
  0x3c   : > { %2685 = vmatprep.mubr.msk.f32.mxu1 %vm469_vm1, %v451_v27  ;;  %3031 = vmatpush3.bf16.msra.mxu1 %v3028_v21  ;;  %v3060_v1 = vpack.c.bf16 %v1112_v0, %v1111_v63  ;;  %v1114_v3 = vld [vmem:[%s4656_s6 + $0x38] sm:$0xff]  ;;  %v1115_v5 = vld [vmem:[%s4656_s6 + $0x40] sm:$0xff]  ;;  %v1116_v6 = vld [vmem:[%s4656_s6 + $0x48] sm:$0xff] }
  0x3d   : > { %2662 = vmatmul.mubr.msk.f32.gmra.mrb[6].mxu0 %vm469_vm1, %v436_v24  ;;  %3033 = vmatprep.subr.bf16.mxu1 %v3032_v28  ;;  %v3064_v4 = vpack.c.bf16 %v1114_v3, %v1113_v2  ;;  %v3068_v7 = vpack.c.bf16 %v1116_v6, %v1115_v5  ;;  %v3958_v8 = vld [vmem:[%s4653_s3] ss:$0 sm:$0xff] }
  0x3e   : > { %2664 = vmatprep.mubr.msk.f32.mxu0 %vm469_vm1, %v437_v25  ;;  %3053 = vmatprep.subr.bf16.mxu0 %v3052_v60 }
  0x3f   : > { %2686 = vmatmul.mubr.msk.f32.gmra.mrb[6].mxu1 %vm469_vm1, %v452_v33  ;;  %3055 = vmatpush3.bf16.msra.mxu0 %v3052_v60 }
  0x40   : > { %2688 = vmatprep.mubr.msk.f32.mxu1 %vm469_vm1, %v453_v34  ;;  %3035 = vmatpush3.bf16.msra.mxu1 %v3032_v28 }
  0x41   : > { %2665 = vmatmul.mubr.msk.f32.gmra.mrb[8].mxu0 %vm469_vm1, %v438_v31  ;;  %3037 = vmatprep.subr.bf16.mxu1 %v3036_v35 }
  0x42   : > { %2667 = vmatprep.mubr.msk.f32.mxu0 %vm469_vm1, %v439_v32  ;;  %3057 = vmatprep.subr.bf16.mxu0 %v3056_v62 }
  0x43   : > { %2689 = vmatmul.mubr.msk.f32.gmra.mrb[8].mxu1 %vm469_vm1, %v454_v38  ;;  %3059 = vmatpush3.bf16.msra.mxu0 %v3056_v62 }
  0x44   : > { %2691 = vmatprep.mubr.msk.f32.mxu1 %vm469_vm1, %v455_v39  ;;  %3039 = vmatpush3.bf16.msra.mxu1 %v3036_v35 }
  0x45   : > { %2668 = vmatmul.mubr.msk.f32.gmra.mrb[10].mxu0 %vm469_vm1, %v440_v36  ;;  %3041 = vmatprep.subr.bf16.mxu1 %v3040_v50 }
  0x46   : > { %2670 = vmatprep.mubr.msk.f32.mxu0 %vm469_vm1, %v441_v37  ;;  %3061 = vmatprep.subr.bf16.mxu0 %v3060_v1 }
  0x47   : > { %2692 = vmatmul.mubr.msk.f32.gmra.mrb[10].mxu1 %vm469_vm1, %v456_v42  ;;  %3063 = vmatpush3.bf16.msra.mxu0 %v3060_v1 }
  0x48   : > { %2694 = vmatprep.mubr.msk.f32.mxu1 %vm469_vm1, %v457_v43  ;;  %3043 = vmatpush3.bf16.msra.mxu1 %v3040_v50 }
  0x49   : > { %2671 = vmatmul.mubr.msk.f32.gmra.mrb[12].mxu0 %vm469_vm1, %v442_v40  ;;  %3045 = vmatprep.subr.bf16.mxu1 %v3044_v53 }
  0x4a   : > { %2673 = vmatprep.mubr.msk.f32.mxu0 %vm469_vm1, %v443_v41  ;;  %3065 = vmatprep.subr.bf16.mxu0 %v3064_v4 }
  0x4b   : > { %2695 = vmatmul.mubr.msk.f32.gmra.mrb[12].mxu1 %vm469_vm1, %v458_v45  ;;  %3067 = vmatpush3.bf16.msra.mxu0 %v3064_v4 }
  0x4c   : > { %2697 = vmatprep.mubr.msk.f32.mxu1 %vm469_vm1, %v459_v46  ;;  %3047 = vmatpush3.bf16.msra.mxu1 %v3044_v53 }
  0x4d   : > { %2674 = vmatmul.mubr.msk.f32.gmra.mrb[14].mxu0 %vm469_vm1, %v444_v44  ;;  %3049 = vmatprep.subr.bf16.mxu1 %v3048_v56 }
  0x4e   : > { %3069 = vmatprep.subr.bf16.mxu0 %v3068_v7 }
  0x4f   : > { %2698 = vmatmul.mubr.msk.f32.gmra.mrb[14].mxu1 %vm469_vm1, %v460_v47  ;;  %3071 = vmatpush3.bf16.msra.mxu0 %v3068_v7 }
  0x50   : > { %3051 = vmatpush3.bf16.msra.mxu1 %v3048_v56 }
 0x104   : > { %v2654_v9 = vpop.f32.mrb[0].mxu0 }
 0x105   : > { %v642_v10 = vadd.f32 %v2654_v9, %v3958_v8  ;;  %v636_v11 = vpop.f32.mrb[1].mxu0 }
 0x106   : > { %v637_v12 = vadd.f32 %v3958_v8, %v636_v11  ;;  %v3963_v16 = vpop.f32.mrb[0].mxu1 }
 0x107   : > { %v716_v18 = vpop.f32.mrb[1].mxu1  ;;  %v722_v3 = vadd.f32 %v3963_v16, %v3958_v8 }
 0x108   : > { %3202 = vtanh.f32 %v637_v12  ;;  %v2657_v13 = vpop.f32.mrb[2].mxu0  ;;  %v717_v57 = vadd.f32 %v3958_v8, %v716_v18 }
 0x109   : > { %3204 = vtanh.f32 %v642_v10  ;;  %v652_v14 = vadd.f32 %v2657_v13, %v3958_v8  ;;  %v646_v15 = vpop.f32.mrb[3].mxu0 }
 0x10a   : > { %v647_v17 = vadd.f32 %v3958_v8, %v646_v15  ;;  %v3967_v22 = vpop.f32.mrb[2].mxu1 }
 0x10b   : > { %v3970_v24 = vpop.f32.mrb[3].mxu1  ;;  %v732_v10 = vadd.f32 %v3967_v22, %v3958_v8 }
 0x10c   : > { %3206 = vtanh.f32 %v647_v17  ;;  %v2660_v19 = vpop.f32.mrb[4].mxu0  ;;  %v727_v2 = vadd.f32 %v3958_v8, %v3970_v24 }
 0x10d   : > { %3208 = vtanh.f32 %v652_v14  ;;  %v662_v20 = vadd.f32 %v2660_v19, %v3958_v8  ;;  %v656_v21 = vpop.f32.mrb[5].mxu0 }
 0x10e   : > { %v657_v23 = vadd.f32 %v3958_v8, %v656_v21  ;;  %v3973_v28 = vpop.f32.mrb[4].mxu1 }
 0x10f   : > { %v3976_v31 = vpop.f32.mrb[5].mxu1  ;;  %v742_v15 = vadd.f32 %v3973_v28, %v3958_v8 }
 0x110   : > { %3210 = vtanh.f32 %v657_v23  ;;  %v2663_v25 = vpop.f32.mrb[6].mxu0  ;;  %v737_v9 = vadd.f32 %v3958_v8, %v3976_v31 }
 0x111   : > { %3212 = vtanh.f32 %v662_v20  ;;  %v672_v26 = vadd.f32 %v2663_v25, %v3958_v8  ;;  %v666_v27 = vpop.f32.mrb[7].mxu0 }
 0x112   : > { %v3203_v29 = vpop.eup %3202  ;;  %v667_v30 = vadd.f32 %v3958_v8, %v666_v27  ;;  %v3979_v36 = vpop.f32.mrb[6].mxu1 }
 0x113   : > { %v3205_v32 = vpop.eup %3204  ;;  %2732 = vmatprep.mubr.f32.mxu1 %v3203_v29  ;;  %v746_v39 = vpop.f32.mrb[7].mxu1  ;;  %v752_v19 = vadd.f32 %v3979_v36, %v3958_v8 }
 0x114   : > { %3214 = vtanh.f32 %v667_v30  ;;  %v2666_v33 = vpop.f32.mrb[8].mxu0  ;;  %2733 = vmatmul.mubr.f32.vlgmr.msra.gmra.mrb[16].mxu1 %v3205_v32  ;;  %v747_v13 = vadd.f32 %v3958_v8, %v746_v39 }
 0x115   : > { %3216 = vtanh.f32 %v672_v26  ;;  %v682_v34 = vadd.f32 %v2666_v33, %v3958_v8  ;;  %v676_v35 = vpop.f32.mrb[9].mxu0 }
 0x116   : > { %v3207_v37 = vpop.eup %3206  ;;  %v677_v38 = vadd.f32 %v3958_v8, %v676_v35  ;;  %v3983_v44 = vpop.f32.mrb[8].mxu1 }
 0x117   : > { %v3209_v40 = vpop.eup %3208  ;;  %2735 = vmatprep.mubr.f32.mxu1 %v3207_v37  ;;  %v756_v47 = vpop.f32.mrb[9].mxu1  ;;  %v762_v23 = vadd.f32 %v3983_v44, %v3958_v8  ;;  %v1119_v44 = vld [vmem:[%s4656_s6 + $0x60] sm:$0xff] }
 0x118   : > { %3218 = vtanh.f32 %v677_v38  ;;  %v2669_v41 = vpop.f32.mrb[10].mxu0  ;;  %2736 = vmatmul.mubr.f32.gmra.mrb[18].mxu1 %v3209_v40  ;;  %v757_v18 = vadd.f32 %v3958_v8, %v756_v47  ;;  %v1121_v47 = vld [vmem:[%s4656_s6 + $0x70] sm:$0xff] }
 0x119   : > { %3220 = vtanh.f32 %v682_v34  ;;  %v692_v42 = vadd.f32 %v2669_v41, %v3958_v8  ;;  %v686_v43 = vpop.f32.mrb[11].mxu0 }
 0x11a   : > { %v3211_v45 = vpop.eup %3210  ;;  %v687_v46 = vadd.f32 %v3958_v8, %v686_v43  ;;  %v3987_v52 = vpop.f32.mrb[10].mxu1 }
 0x11b   : > { %v3213_v48 = vpop.eup %3212  ;;  %2738 = vmatprep.mubr.f32.mxu1 %v3211_v45  ;;  %v766_v55 = vpop.f32.mrb[11].mxu1  ;;  %v772_v27 = vadd.f32 %v3987_v52, %v3958_v8  ;;  %v1120_v45 = vld [vmem:[%s4656_s6 + $0x68] sm:$0xff]  ;;  %v1389_v52 = vld [vmem:[%s4658_s8 + $0x10] sm:$0xff] }
 0x11c   : > { %3222 = vtanh.f32 %v687_v46  ;;  %v2672_v49 = vpop.f32.mrb[12].mxu0  ;;  %2739 = vmatmul.mubr.f32.gmra.mrb[20].mxu1 %v3213_v48  ;;  %v767_v22 = vadd.f32 %v3958_v8, %v766_v55  ;;  %v3076_v46 = vpack.c.bf16 %v1120_v45, %v1119_v44  ;;  %v1122_v48 = vld [vmem:[%s4656_s6 + $0x78] sm:$0xff] }
 0x11d   : > { %3224 = vtanh.f32 %v692_v42  ;;  %v702_v50 = vadd.f32 %v2672_v49, %v3958_v8  ;;  %v696_v51 = vpop.f32.mrb[13].mxu0  ;;  %v1118_v42 = vld [vmem:[%s4656_s6 + $0x58] sm:$0xff]  ;;  %v3080_v49 = vpack.c.bf16 %v1122_v48, %v1121_v47 }
 0x11e   : > { %v3215_v53 = vpop.eup %3214  ;;  %v697_v54 = vadd.f32 %v3958_v8, %v696_v51  ;;  %v2696_v61 = vpop.f32.mrb[12].mxu1  ;;  %v1388_v51 = vld [vmem:[%s4658_s8 + $0x8] sm:$0xff] }
 0x11f   : > { %v3217_v56 = vpop.eup %3216  ;;  %2741 = vmatprep.mubr.f32.mxu1 %v3215_v53  ;;  %v776_v0 = vpop.f32.mrb[13].mxu1  ;;  %v782_v31 = vadd.f32 %v2696_v61, %v3958_v8 }
 0x120   : > { %3226 = vtanh.f32 %v697_v54  ;;  %v2675_v58 = vpop.f32.mrb[14].mxu0  ;;  %2742 = vmatmul.mubr.f32.gmra.mrb[22].mxu1 %v3217_v56  ;;  %v777_v26 = vadd.f32 %v3958_v8, %v776_v0  ;;  %v1390_v54 = vld [vmem:[%s4658_s8 + $0x18] sm:$0xff]  ;;  %v1391_v56 = vld [vmem:[%s4658_s8 + $0x20] sm:$0xff] }
 0x121   : > { %3228 = vtanh.f32 %v702_v50  ;;  %v712_v59 = vadd.f32 %v2675_v58, %v3958_v8  ;;  %v706_v60 = vpop.f32.mrb[15].mxu0  ;;  %v1387_v50 = vld [vmem:[%s4658_s8] sm:$0xff]  ;;  %v3088_v55 = vpack.c.bf16 %v1390_v54, %v1389_v52 }
 0x122   : > { %v3219_v62 = vpop.eup %3218  ;;  %v707_v63 = vadd.f32 %v3958_v8, %v706_v60  ;;  %3230 = vtanh.f32 %v717_v57  ;;  %v2699_v4 = vpop.f32.mrb[14].mxu1  ;;  %v3084_v53 = vpack.c.bf16 %v1388_v51, %v1387_v50  ;;  %v1392_v57 = vld [vmem:[%s4658_s8 + $0x28] sm:$0xff]  ;;  %v1394_v60 = vld [vmem:[%s4658_s8 + $0x38] sm:$0xff] }
 0x123   : > { %v3221_v1 = vpop.eup %3220  ;;  %2744 = vmatprep.mubr.f32.mxu1 %v3219_v62  ;;  %v786_v6 = vpop.f32.mrb[15].mxu1  ;;  %v792_v34 = vadd.f32 %v2699_v4, %v3958_v8  ;;  %v3092_v58 = vpack.c.bf16 %v1392_v57, %v1391_v56  ;;  %v1395_v62 = vld [vmem:[%s4658_s8 + $0x40] sm:$0xff] }
 0x124   : > { %3232 = vtanh.f32 %v707_v63  ;;  %2745 = vmatmul.mubr.f32.gmra.mrb[24].mxu1 %v3221_v1  ;;  %v787_v30 = vadd.f32 %v3958_v8, %v786_v6  ;;  %v1117_v8 = vld [vmem:[%s4656_s6 + $0x50] sm:$0xff]  ;;  %3085 = vmatprep.subr.bf16.mxu1 %v3084_v53  ;;  %v1396_v63 = vld [vmem:[%s4658_s8 + $0x48] sm:$0xff]  ;;  %v1399_v4 = vld [vmem:[%s4658_s8 + $0x60] sm:$0xff] }
 0x125   : > { %3234 = vtanh.f32 %v712_v59  ;;  %v3072_v43 = vpack.c.bf16 %v1118_v42, %v1117_v8  ;;  %3087 = vmatpush3.bf16.msra.mxu1 %v3084_v53  ;;  %v1393_v59 = vld [vmem:[%s4658_s8 + $0x30] sm:$0xff]  ;;  %v3100_v0 = vpack.c.bf16 %v1396_v63, %v1395_v62 }
 0x126   : > { %v3223_v5 = vpop.eup %3222  ;;  %3236 = vtanh.f32 %v727_v2  ;;  %3089 = vmatprep.subr.bf16.mxu1 %v3088_v55  ;;  %v3096_v61 = vpack.c.bf16 %v1394_v60, %v1393_v59  ;;  %v1397_v1 = vld [vmem:[%s4658_s8 + $0x50] sm:$0xff]  ;;  %v1398_v2 = vld [vmem:[%s4658_s8 + $0x58] sm:$0xff] }
 0x127   : > { %v3225_v7 = vpop.eup %3224  ;;  %2747 = vmatprep.mubr.f32.mxu1 %v3223_v5  ;;  %3238 = vtanh.f32 %v722_v3  ;;  %3073 = vmatprep.subr.bf16.mxu0 %v3072_v43  ;;  %v3104_v3 = vpack.c.bf16 %v1398_v2, %v1397_v1  ;;  %v1400_v5 = vld [vmem:[%s4658_s8 + $0x68] sm:$0xff] }
 0x128   : > { %2748 = vmatmul.mubr.f32.gmra.mrb[26].mxu1 %v3225_v7  ;;  %3240 = vtanh.f32 %v737_v9  ;;  %3075 = vmatpush3.bf16.msra.mxu0 %v3072_v43  ;;  %v3108_v6 = vpack.c.bf16 %v1400_v5, %v1399_v4  ;;  %v4079_v7 = vld [vmem:[%s4655_s5] ss:$0 sm:$0xff] }
 0x129   : > { %3242 = vtanh.f32 %v732_v10  ;;  %3077 = vmatprep.subr.bf16.mxu0 %v3076_v46  ;;  %3091 = vmatpush3.bf16.msra.mxu1 %v3088_v55 }
 0x12a   : > { %v3227_v11 = vpop.eup %3226  ;;  %3244 = vtanh.f32 %v747_v13  ;;  %3093 = vmatprep.subr.bf16.mxu1 %v3092_v58 }
 0x12b   : > { %v3229_v12 = vpop.eup %3228  ;;  %2750 = vmatprep.mubr.f32.mxu1 %v3227_v11  ;;  %3246 = vtanh.f32 %v742_v15 }
 0x12c   : > { %2751 = vmatmul.mubr.f32.gmra.mrb[28].mxu1 %v3229_v12  ;;  %v3231_v14 = vpop.eup %3230  ;;  %3248 = vtanh.f32 %v757_v18  ;;  %3079 = vmatpush3.bf16.msra.mxu0 %v3076_v46 }
 0x12d   : > { %3250 = vtanh.f32 %v752_v19  ;;  %3081 = vmatprep.subr.bf16.mxu0 %v3080_v49  ;;  %3095 = vmatpush3.bf16.msra.mxu1 %v3092_v58 }
 0x12e   : > { %v3233_v16 = vpop.eup %3232  ;;  %3252 = vtanh.f32 %v767_v22  ;;  %3097 = vmatprep.subr.bf16.mxu1 %v3096_v61 }
 0x12f   : > { %v3235_v17 = vpop.eup %3234  ;;  %2753 = vmatprep.mubr.f32.mxu1 %v3233_v16  ;;  %3254 = vtanh.f32 %v762_v23 }
 0x130   : > { %2754 = vmatmul.mubr.f32.gmra.mrb[30].mxu1 %v3235_v17  ;;  %v3237_v20 = vpop.eup %3236  ;;  %3256 = vtanh.f32 %v777_v26  ;;  %3083 = vmatpush3.bf16.msra.mxu0 %v3080_v49 }
 0x131   : > { %2756 = vmatprep.mubr.f32.mxu1 %v3231_v14  ;;  %v3239_v21 = vpop.eup %3238  ;;  %3258 = vtanh.f32 %v772_v27  ;;  %3099 = vmatpush3.bf16.msra.mxu1 %v3096_v61 }
 0x132   : > { %v3241_v24 = vpop.eup %3240  ;;  %3260 = vtanh.f32 %v787_v30  ;;  %3101 = vmatprep.subr.bf16.mxu1 %v3100_v0 }
 0x133   : > { %v3243_v25 = vpop.eup %3242  ;;  %3262 = vtanh.f32 %v782_v31 }
 0x134   : > { %2757 = vmatmul.mubr.f32.gmra.mrb[32].mxu1 %v3239_v21  ;;  %v3245_v28 = vpop.eup %3244  ;;  %3264 = vtanh.f32 %v792_v34 }
 0x135   : > { %2759 = vmatprep.mubr.f32.mxu1 %v3237_v20  ;;  %v3247_v29 = vpop.eup %3246  ;;  %3103 = vmatpush3.bf16.msra.mxu1 %v3100_v0 }
 0x136   : > { %v3249_v32 = vpop.eup %3248  ;;  %3105 = vmatprep.subr.bf16.mxu1 %v3104_v3 }
 0x137   : > { %v3251_v33 = vpop.eup %3250 }
 0x138   : > { %2760 = vmatmul.mubr.f32.gmra.mrb[34].mxu1 %v3243_v25  ;;  %v3253_v35 = vpop.eup %3252 }
 0x139   : > { %2762 = vmatprep.mubr.f32.mxu1 %v3241_v24  ;;  %v3255_v36 = vpop.eup %3254  ;;  %3107 = vmatpush3.bf16.msra.mxu1 %v3104_v3 }
 0x13a   : > { %v3257_v37 = vpop.eup %3256  ;;  %3109 = vmatprep.subr.bf16.mxu1 %v3108_v6 }
 0x13b   : > { %v3259_v38 = vpop.eup %3258 }
 0x13c   : > { %2763 = vmatmul.mubr.f32.gmra.mrb[36].mxu1 %v3247_v29  ;;  %v3261_v39 = vpop.eup %3260 }
 0x13d   : > { %2765 = vmatprep.mubr.f32.mxu1 %v3245_v28  ;;  %v3263_v40 = vpop.eup %3262  ;;  %3111 = vmatpush3.bf16.msra.mxu1 %v3108_v6 }
 0x13e   : > { %v3265_v41 = vpop.eup %3264 }
 0x140   : > { %2766 = vmatmul.mubr.f32.gmra.mrb[38].mxu1 %v3251_v33 }
 0x141   : > { %2768 = vmatprep.mubr.f32.mxu1 %v3249_v32 }
 0x144   : > { %2769 = vmatmul.mubr.f32.gmra.mrb[40].mxu1 %v3255_v36 }
 0x145   : > { %2771 = vmatprep.mubr.f32.mxu1 %v3253_v35 }
 0x148   : > { %2772 = vmatmul.mubr.f32.gmra.mrb[42].mxu1 %v3259_v38 }
 0x149   : > { %2774 = vmatprep.mubr.f32.mxu1 %v3257_v37 }
 0x14c   : > { %2775 = vmatmul.mubr.f32.gmra.mrb[44].mxu1 %v3263_v40 }
 0x14d   : > { %2777 = vmatprep.mubr.f32.mxu1 %v3261_v39 }
 0x150   : > { %2778 = vmatmul.mubr.f32.gmra.mrb[46].mxu1 %v3265_v41 }
 0x1e7   : > { %v2734_v9 = vpop.f32.mrb[16].mxu1 }
 0x1e8   : > { %v922_v10 = vadd.f32 %v2734_v9, %v4079_v7  ;;  %v916_v11 = vpop.f32.mrb[17].mxu1 }
 0x1e9   : > { %v917_v12 = vadd.f32 %v4079_v7, %v916_v11 }
 0x1eb   : > { %3266 = vtanh.f32 %v917_v12  ;;  %v2737_v13 = vpop.f32.mrb[18].mxu1 }
 0x1ec   : > { %3268 = vtanh.f32 %v922_v10  ;;  %v932_v14 = vadd.f32 %v2737_v13, %v4079_v7  ;;  %v926_v15 = vpop.f32.mrb[19].mxu1 }
 0x1ed   : > { %v927_v16 = vadd.f32 %v4079_v7, %v926_v15 }
 0x1ef   : > { %3270 = vtanh.f32 %v927_v16  ;;  %v2740_v17 = vpop.f32.mrb[20].mxu1 }
 0x1f0   : > { %3272 = vtanh.f32 %v932_v14  ;;  %v942_v18 = vadd.f32 %v2740_v17, %v4079_v7  ;;  %v936_v19 = vpop.f32.mrb[21].mxu1 }
 0x1f1   : > { %v937_v20 = vadd.f32 %v4079_v7, %v936_v19 }
 0x1f3   : > { %3274 = vtanh.f32 %v937_v20  ;;  %v2743_v21 = vpop.f32.mrb[22].mxu1 }
 0x1f4   : > { %3276 = vtanh.f32 %v942_v18  ;;  %v952_v22 = vadd.f32 %v2743_v21, %v4079_v7  ;;  %v946_v23 = vpop.f32.mrb[23].mxu1 }
 0x1f5   : > { %v3267_v24 = vpop.eup %3266  ;;  %v947_v25 = vadd.f32 %v4079_v7, %v946_v23 }
 0x1f6   : > { %v3269_v26 = vpop.eup %3268  ;;  %2812 = vmatprep.mubr.f32.mxu0 %v3267_v24 }
 0x1f7   : > { %3278 = vtanh.f32 %v947_v25  ;;  %v2746_v27 = vpop.f32.mrb[24].mxu1  ;;  %2813 = vmatmul.mubr.f32.vlgmr.msra.gmra.mrb[16].mxu0 %v3269_v26 }
 0x1f8   : > { %3280 = vtanh.f32 %v952_v22  ;;  %v962_v28 = vadd.f32 %v2746_v27, %v4079_v7  ;;  %v956_v29 = vpop.f32.mrb[25].mxu1 }
 0x1f9   : > { %v3271_v30 = vpop.eup %3270  ;;  %v957_v31 = vadd.f32 %v4079_v7, %v956_v29 }
 0x1fa   : > { %v3273_v32 = vpop.eup %3272  ;;  %2815 = vmatprep.mubr.f32.mxu0 %v3271_v30 }
 0x1fb   : > { %3282 = vtanh.f32 %v957_v31  ;;  %v2749_v33 = vpop.f32.mrb[26].mxu1  ;;  %2816 = vmatmul.mubr.f32.gmra.mrb[18].mxu0 %v3273_v32 }
 0x1fc   : > { %3284 = vtanh.f32 %v962_v28  ;;  %v972_v34 = vadd.f32 %v2749_v33, %v4079_v7  ;;  %v966_v35 = vpop.f32.mrb[27].mxu1 }
 0x1fd   : > { %v3275_v36 = vpop.eup %3274  ;;  %v967_v37 = vadd.f32 %v4079_v7, %v966_v35 }
 0x1fe   : > { %v3277_v38 = vpop.eup %3276  ;;  %2818 = vmatprep.mubr.f32.mxu0 %v3275_v36 }
 0x1ff   : > { %3286 = vtanh.f32 %v967_v37  ;;  %v2752_v39 = vpop.f32.mrb[28].mxu1  ;;  %2819 = vmatmul.mubr.f32.gmra.mrb[20].mxu0 %v3277_v38 }
 0x200   : > { %3288 = vtanh.f32 %v972_v34  ;;  %v982_v40 = vadd.f32 %v2752_v39, %v4079_v7  ;;  %v976_v41 = vpop.f32.mrb[29].mxu1 }
 0x201   : > { %v3279_v8 = vpop.eup %3278  ;;  %v977_v42 = vadd.f32 %v4079_v7, %v976_v41 }
 0x202   : > { %v3281_v43 = vpop.eup %3280  ;;  %2821 = vmatprep.mubr.f32.mxu0 %v3279_v8  ;;  %v1402_v8 = vld [vmem:[%s4658_s8 + $0x78] sm:$0xff] }
 0x203   : > { %3290 = vtanh.f32 %v977_v42  ;;  %v2755_v44 = vpop.f32.mrb[30].mxu1  ;;  %2822 = vmatmul.mubr.f32.gmra.mrb[22].mxu0 %v3281_v43  ;;  %v1667_v43 = vld [vmem:[%s4660_s10] sm:$0xff] }
 0x204   : > { %3292 = vtanh.f32 %v982_v40  ;;  %v992_v45 = vadd.f32 %v2755_v44, %v4079_v7  ;;  %v986_v46 = vpop.f32.mrb[31].mxu1  ;;  %v1668_v44 = vld [vmem:[%s4660_s10 + $0x8] sm:$0xff] }
 0x205   : > { %v3283_v47 = vpop.eup %3282  ;;  %v987_v48 = vadd.f32 %v4079_v7, %v986_v46  ;;  %v3116_v46 = vpack.c.bf16 %v1668_v44, %v1667_v43 }
 0x206   : > { %v3285_v49 = vpop.eup %3284  ;;  %2824 = vmatprep.mubr.f32.mxu0 %v3283_v47  ;;  %v1670_v47 = vld [vmem:[%s4660_s10 + $0x18] sm:$0xff] }
 0x207   : > { %3294 = vtanh.f32 %v987_v48  ;;  %v2758_v50 = vpop.f32.mrb[32].mxu1  ;;  %2825 = vmatmul.mubr.f32.gmra.mrb[24].mxu0 %v3285_v49  ;;  %v1671_v49 = vld [vmem:[%s4660_s10 + $0x20] sm:$0xff]  ;;  %3117 = vmatprep.subr.bf16.mxu0 %v3116_v46 }
 0x208   : > { %3296 = vtanh.f32 %v992_v45  ;;  %v1002_v51 = vadd.f32 %v2758_v50, %v4079_v7  ;;  %v996_v52 = vpop.f32.mrb[33].mxu1  ;;  %v1669_v45 = vld [vmem:[%s4660_s10 + $0x10] sm:$0xff]  ;;  %v1672_v50 = vld [vmem:[%s4660_s10 + $0x28] sm:$0xff]  ;;  %3119 = vmatpush3.bf16.msra.mxu0 %v3116_v46 }
 0x209   : > { %v3287_v53 = vpop.eup %3286  ;;  %v997_v54 = vadd.f32 %v4079_v7, %v996_v52  ;;  %v3120_v48 = vpack.c.bf16 %v1670_v47, %v1669_v45  ;;  %v1673_v52 = vld [vmem:[%s4660_s10 + $0x30] sm:$0xff] }
 0x20a   : > { %v3289_v55 = vpop.eup %3288  ;;  %2827 = vmatprep.mubr.f32.mxu0 %v3287_v53  ;;  %v1674_v53 = vld [vmem:[%s4660_s10 + $0x38] sm:$0xff] }
 0x20b   : > { %3298 = vtanh.f32 %v997_v54  ;;  %v2761_v56 = vpop.f32.mrb[34].mxu1  ;;  %2828 = vmatmul.mubr.f32.gmra.mrb[26].mxu0 %v3289_v55  ;;  %3121 = vmatprep.subr.bf16.mxu0 %v3120_v48  ;;  %v3128_v54 = vpack.c.bf16 %v1674_v53, %v1673_v52  ;;  %v1675_v55 = vld [vmem:[%s4660_s10 + $0x40] sm:$0xff] }
 0x20c   : > { %3300 = vtanh.f32 %v1002_v51  ;;  %v1012_v57 = vadd.f32 %v2761_v56, %v4079_v7  ;;  %v1006_v58 = vpop.f32.mrb[35].mxu1  ;;  %v3124_v51 = vpack.c.bf16 %v1672_v50, %v1671_v49  ;;  %3123 = vmatpush3.bf16.msra.mxu0 %v3120_v48  ;;  %v1676_v56 = vld [vmem:[%s4660_s10 + $0x48] sm:$0xff] }
 0x20d   : > { %v3291_v59 = vpop.eup %3290  ;;  %v1007_v60 = vadd.f32 %v4079_v7, %v1006_v58  ;;  %v1677_v58 = vld [vmem:[%s4660_s10 + $0x50] sm:$0xff] }
 0x20e   : > { %v3293_v61 = vpop.eup %3292  ;;  %2830 = vmatprep.mubr.f32.mxu0 %v3291_v59  ;;  %3125 = vmatprep.subr.bf16.mxu0 %v3124_v51  ;;  %v1678_v59 = vld [vmem:[%s4660_s10 + $0x58] sm:$0xff] }
 0x20f   : > { %3302 = vtanh.f32 %v1007_v60  ;;  %v2764_v62 = vpop.f32.mrb[36].mxu1  ;;  %2831 = vmatmul.mubr.f32.gmra.mrb[28].mxu0 %v3293_v61  ;;  %v3136_v60 = vpack.c.bf16 %v1678_v59, %v1677_v58  ;;  %v1679_v61 = vld [vmem:[%s4660_s10 + $0x60] sm:$0xff] }
 0x210   : > { %3304 = vtanh.f32 %v1012_v57  ;;  %v1022_v63 = vadd.f32 %v2764_v62, %v4079_v7  ;;  %v1016_v0 = vpop.f32.mrb[37].mxu1  ;;  %3127 = vmatpush3.bf16.msra.mxu0 %v3124_v51  ;;  %v3132_v57 = vpack.c.bf16 %v1676_v56, %v1675_v55  ;;  %v1680_v62 = vld [vmem:[%s4660_s10 + $0x68] sm:$0xff] }
 0x211   : > { %v3295_v1 = vpop.eup %3294  ;;  %v1017_v2 = vadd.f32 %v4079_v7, %v1016_v0  ;;  %3129 = vmatprep.subr.bf16.mxu0 %v3128_v54  ;;  %v4164_v0 = vld [vmem:[%s4657_s7] ss:$0 sm:$0xff] }
 0x212   : > { %v3297_v3 = vpop.eup %3296  ;;  %2833 = vmatprep.mubr.f32.mxu0 %v3295_v1 }
 0x213   : > { %3306 = vtanh.f32 %v1017_v2  ;;  %v2767_v4 = vpop.f32.mrb[38].mxu1  ;;  %2834 = vmatmul.mubr.f32.gmra.mrb[30].mxu0 %v3297_v3 }
 0x214   : > { %3308 = vtanh.f32 %v1022_v63  ;;  %v1032_v5 = vadd.f32 %v2767_v4, %v4079_v7  ;;  %v1026_v6 = vpop.f32.mrb[39].mxu1  ;;  %3131 = vmatpush3.bf16.msra.mxu0 %v3128_v54  ;;  %v3140_v63 = vpack.c.bf16 %v1680_v62, %v1679_v61 }
 0x215   : > { %v3299_v9 = vpop.eup %3298  ;;  %v1027_v10 = vadd.f32 %v4079_v7, %v1026_v6  ;;  %3133 = vmatprep.subr.bf16.mxu0 %v3132_v57 }
 0x216   : > { %v3301_v11 = vpop.eup %3300  ;;  %2836 = vmatprep.mubr.f32.mxu0 %v3299_v9 }
 0x217   : > { %3310 = vtanh.f32 %v1027_v10  ;;  %v2770_v12 = vpop.f32.mrb[40].mxu1  ;;  %2837 = vmatmul.mubr.f32.gmra.mrb[32].mxu0 %v3301_v11 }
 0x218   : > { %3312 = vtanh.f32 %v1032_v5  ;;  %v1042_v13 = vadd.f32 %v2770_v12, %v4079_v7  ;;  %v1036_v14 = vpop.f32.mrb[41].mxu1  ;;  %3135 = vmatpush3.bf16.msra.mxu0 %v3132_v57 }
 0x219   : > { %v3303_v15 = vpop.eup %3302  ;;  %v1037_v16 = vadd.f32 %v4079_v7, %v1036_v14  ;;  %3137 = vmatprep.subr.bf16.mxu0 %v3136_v60 }
 0x21a   : > { %v3305_v17 = vpop.eup %3304  ;;  %2839 = vmatprep.mubr.f32.mxu0 %v3303_v15 }
 0x21b   : > { %3314 = vtanh.f32 %v1037_v16  ;;  %v2773_v18 = vpop.f32.mrb[42].mxu1  ;;  %2840 = vmatmul.mubr.f32.gmra.mrb[34].mxu0 %v3305_v17 }
 0x21c   : > { %3316 = vtanh.f32 %v1042_v13  ;;  %v1052_v19 = vadd.f32 %v2773_v18, %v4079_v7  ;;  %v1046_v20 = vpop.f32.mrb[43].mxu1  ;;  %3139 = vmatpush3.bf16.msra.mxu0 %v3136_v60 }
 0x21d   : > { %v3307_v21 = vpop.eup %3306  ;;  %v1047_v22 = vadd.f32 %v4079_v7, %v1046_v20  ;;  %3141 = vmatprep.subr.bf16.mxu0 %v3140_v63 }
 0x21e   : > { %v3309_v23 = vpop.eup %3308  ;;  %2842 = vmatprep.mubr.f32.mxu0 %v3307_v21 }
 0x21f   : > { %3318 = vtanh.f32 %v1047_v22  ;;  %v2776_v24 = vpop.f32.mrb[44].mxu1  ;;  %2843 = vmatmul.mubr.f32.gmra.mrb[36].mxu0 %v3309_v23 }
 0x220   : > { %3320 = vtanh.f32 %v1052_v19  ;;  %v1062_v25 = vadd.f32 %v2776_v24, %v4079_v7  ;;  %v1056_v26 = vpop.f32.mrb[45].mxu1  ;;  %3143 = vmatpush3.bf16.msra.mxu0 %v3140_v63 }
 0x221   : > { %v3311_v27 = vpop.eup %3310  ;;  %v1057_v28 = vadd.f32 %v4079_v7, %v1056_v26 }
 0x222   : > { %v3313_v29 = vpop.eup %3312  ;;  %2845 = vmatprep.mubr.f32.mxu0 %v3311_v27 }
 0x223   : > { %3322 = vtanh.f32 %v1057_v28  ;;  %v2779_v30 = vpop.f32.mrb[46].mxu1  ;;  %2846 = vmatmul.mubr.f32.gmra.mrb[38].mxu0 %v3313_v29 }
 0x224   : > { %3324 = vtanh.f32 %v1062_v25  ;;  %v1072_v31 = vadd.f32 %v2779_v30, %v4079_v7  ;;  %v1066_v32 = vpop.f32.mrb[47].mxu1 }
 0x225   : > { %v3315_v33 = vpop.eup %3314  ;;  %v1067_v34 = vadd.f32 %v4079_v7, %v1066_v32  ;;  %v1401_v7 = vld [vmem:[%s4658_s8 + $0x70] sm:$0xff] }
 0x226   : > { %v3317_v35 = vpop.eup %3316  ;;  %2848 = vmatprep.mubr.f32.mxu0 %v3315_v33  ;;  %v3112_v42 = vpack.c.bf16 %v1402_v8, %v1401_v7 }
 0x227   : > { %3326 = vtanh.f32 %v1067_v34  ;;  %2849 = vmatmul.mubr.f32.gmra.mrb[40].mxu0 %v3317_v35 }
 0x228   : > { %3328 = vtanh.f32 %v1072_v31  ;;  %3113 = vmatprep.subr.bf16.mxu1 %v3112_v42 }
 0x229   : > { %v3319_v36 = vpop.eup %3318  ;;  %3115 = vmatpush3.bf16.msra.mxu1 %v3112_v42 }
 0x22a   : > { %v3321_v37 = vpop.eup %3320  ;;  %2851 = vmatprep.mubr.f32.mxu0 %v3319_v36 }
 0x22b   : > { %2852 = vmatmul.mubr.f32.gmra.mrb[42].mxu0 %v3321_v37 }
 0x22d   : > { %v3323_v38 = vpop.eup %3322 }
 0x22e   : > { %v3325_v39 = vpop.eup %3324  ;;  %2854 = vmatprep.mubr.f32.mxu0 %v3323_v38 }
 0x22f   : > { %2855 = vmatmul.mubr.f32.gmra.mrb[44].mxu0 %v3325_v39 }
 0x231   : > { %v3327_v40 = vpop.eup %3326 }
 0x232   : > { %v3329_v41 = vpop.eup %3328  ;;  %2857 = vmatprep.mubr.f32.mxu0 %v3327_v40 }
 0x233   : > { %2858 = vmatmul.mubr.f32.gmra.mrb[46].mxu0 %v3329_v41 }
 0x2ca   : > { %v2814_v1 = vpop.f32.mrb[16].mxu0 }
 0x2cb   : > { %v1202_v2 = vadd.f32 %v2814_v1, %v4164_v0  ;;  %v1196_v3 = vpop.f32.mrb[17].mxu0 }
 0x2cc   : > { %v1197_v4 = vadd.f32 %v4164_v0, %v1196_v3 }
 0x2ce   : > { %3330 = vtanh.f32 %v1197_v4  ;;  %v2817_v5 = vpop.f32.mrb[18].mxu0 }
 0x2cf   : > { %3332 = vtanh.f32 %v1202_v2  ;;  %v1212_v6 = vadd.f32 %v2817_v5, %v4164_v0  ;;  %v1206_v9 = vpop.f32.mrb[19].mxu0 }
 0x2d0   : > { %v1207_v10 = vadd.f32 %v4164_v0, %v1206_v9 }
 0x2d2   : > { %3334 = vtanh.f32 %v1207_v10  ;;  %v2820_v11 = vpop.f32.mrb[20].mxu0 }
 0x2d3   : > { %3336 = vtanh.f32 %v1212_v6  ;;  %v1222_v12 = vadd.f32 %v2820_v11, %v4164_v0  ;;  %v1216_v13 = vpop.f32.mrb[21].mxu0 }
 0x2d4   : > { %v1217_v14 = vadd.f32 %v4164_v0, %v1216_v13 }
 0x2d6   : > { %3338 = vtanh.f32 %v1217_v14  ;;  %v2823_v15 = vpop.f32.mrb[22].mxu0 }
 0x2d7   : > { %3340 = vtanh.f32 %v1222_v12  ;;  %v1232_v16 = vadd.f32 %v2823_v15, %v4164_v0  ;;  %v1226_v17 = vpop.f32.mrb[23].mxu0 }
 0x2d8   : > { %v3331_v18 = vpop.eup %3330  ;;  %v1227_v19 = vadd.f32 %v4164_v0, %v1226_v17 }
 0x2d9   : > { %v3333_v20 = vpop.eup %3332  ;;  %2892 = vmatprep.mubr.f32.mxu1 %v3331_v18 }
 0x2da   : > { %3342 = vtanh.f32 %v1227_v19  ;;  %v2826_v21 = vpop.f32.mrb[24].mxu0  ;;  %2893 = vmatmul.mubr.f32.vlgmr.msra.gmra.mrb[48].mxu1 %v3333_v20 }
 0x2db   : > { %3344 = vtanh.f32 %v1232_v16  ;;  %v1242_v22 = vadd.f32 %v2826_v21, %v4164_v0  ;;  %v1236_v23 = vpop.f32.mrb[25].mxu0 }
 0x2dc   : > { %v3335_v24 = vpop.eup %3334  ;;  %v1237_v25 = vadd.f32 %v4164_v0, %v1236_v23 }
 0x2dd   : > { %v3337_v26 = vpop.eup %3336  ;;  %2895 = vmatprep.mubr.f32.mxu1 %v3335_v24 }
 0x2de   : > { %3346 = vtanh.f32 %v1237_v25  ;;  %v2829_v27 = vpop.f32.mrb[26].mxu0  ;;  %2896 = vmatmul.mubr.f32.gmra.mrb[50].mxu1 %v3337_v26 }
 0x2df   : > { %3348 = vtanh.f32 %v1242_v22  ;;  %v1252_v28 = vadd.f32 %v2829_v27, %v4164_v0  ;;  %v1246_v29 = vpop.f32.mrb[27].mxu0 }
 0x2e0   : > { %v3339_v30 = vpop.eup %3338  ;;  %v1247_v31 = vadd.f32 %v4164_v0, %v1246_v29 }
 0x2e1   : > { %v3341_v32 = vpop.eup %3340  ;;  %2898 = vmatprep.mubr.f32.mxu1 %v3339_v30 }
 0x2e2   : > { %3350 = vtanh.f32 %v1247_v31  ;;  %v2832_v33 = vpop.f32.mrb[28].mxu0  ;;  %2899 = vmatmul.mubr.f32.gmra.mrb[52].mxu1 %v3341_v32 }
 0x2e3   : > { %3352 = vtanh.f32 %v1252_v28  ;;  %v1262_v34 = vadd.f32 %v2832_v33, %v4164_v0  ;;  %v1256_v35 = vpop.f32.mrb[29].mxu0 }
 0x2e4   : > { %v3343_v36 = vpop.eup %3342  ;;  %v1257_v37 = vadd.f32 %v4164_v0, %v1256_v35 }
 0x2e5   : > { %v3345_v38 = vpop.eup %3344  ;;  %2901 = vmatprep.mubr.f32.mxu1 %v3343_v36  ;;  %v1682_v36 = vld [vmem:[%s4660_s10 + $0x78] sm:$0xff] }
 0x2e6   : > { %3354 = vtanh.f32 %v1257_v37  ;;  %v2835_v39 = vpop.f32.mrb[30].mxu0  ;;  %2902 = vmatmul.mubr.f32.gmra.mrb[54].mxu1 %v3345_v38  ;;  %v4207_v38 = vld [vmem:[%s4659_s9] ss:$0 sm:$0xff] }
 0x2e7   : > { %3356 = vtanh.f32 %v1262_v34  ;;  %v1272_v40 = vadd.f32 %v2835_v39, %v4164_v0  ;;  %v1266_v41 = vpop.f32.mrb[31].mxu0 }
 0x2e8   : > { %v3347_v7 = vpop.eup %3346  ;;  %v1267_v8 = vadd.f32 %v4164_v0, %v1266_v41 }
 0x2e9   : > { %v3349_v42 = vpop.eup %3348  ;;  %2904 = vmatprep.mubr.f32.mxu1 %v3347_v7 }
 0x2ea   : > { %3358 = vtanh.f32 %v1267_v8  ;;  %v2838_v43 = vpop.f32.mrb[32].mxu0  ;;  %2905 = vmatmul.mubr.f32.gmra.mrb[56].mxu1 %v3349_v42 }
 0x2eb   : > { %3360 = vtanh.f32 %v1272_v40  ;;  %v1282_v44 = vadd.f32 %v2838_v43, %v4164_v0  ;;  %v1276_v45 = vpop.f32.mrb[33].mxu0 }
 0x2ec   : > { %v3351_v46 = vpop.eup %3350  ;;  %v1277_v47 = vadd.f32 %v4164_v0, %v1276_v45 }
 0x2ed   : > { %v3353_v48 = vpop.eup %3352  ;;  %2907 = vmatprep.mubr.f32.mxu1 %v3351_v46 }
 0x2ee   : > { %3362 = vtanh.f32 %v1277_v47  ;;  %v2841_v49 = vpop.f32.mrb[34].mxu0  ;;  %2908 = vmatmul.mubr.f32.gmra.mrb[58].mxu1 %v3353_v48 }
 0x2ef   : > { %3364 = vtanh.f32 %v1282_v44  ;;  %v1292_v50 = vadd.f32 %v2841_v49, %v4164_v0  ;;  %v1286_v51 = vpop.f32.mrb[35].mxu0 }
 0x2f0   : > { %v3355_v52 = vpop.eup %3354  ;;  %v1287_v53 = vadd.f32 %v4164_v0, %v1286_v51 }
 0x2f1   : > { %v3357_v54 = vpop.eup %3356  ;;  %2910 = vmatprep.mubr.f32.mxu1 %v3355_v52 }
 0x2f2   : > { %3366 = vtanh.f32 %v1287_v53  ;;  %v2844_v55 = vpop.f32.mrb[36].mxu0  ;;  %2911 = vmatmul.mubr.f32.gmra.mrb[60].mxu1 %v3357_v54 }
 0x2f3   : > { %3368 = vtanh.f32 %v1292_v50  ;;  %v1302_v56 = vadd.f32 %v2844_v55, %v4164_v0  ;;  %v1296_v57 = vpop.f32.mrb[37].mxu0 }
 0x2f4   : > { %v3359_v58 = vpop.eup %3358  ;;  %v1297_v59 = vadd.f32 %v4164_v0, %v1296_v57 }
 0x2f5   : > { %v3361_v60 = vpop.eup %3360  ;;  %2913 = vmatprep.mubr.f32.mxu1 %v3359_v58 }
 0x2f6   : > { %3370 = vtanh.f32 %v1297_v59  ;;  %v2847_v61 = vpop.f32.mrb[38].mxu0  ;;  %2914 = vmatmul.mubr.f32.gmra.mrb[62].mxu1 %v3361_v60 }
 0x2f7   : > { %3372 = vtanh.f32 %v1302_v56  ;;  %v1312_v62 = vadd.f32 %v2847_v61, %v4164_v0  ;;  %v1306_v63 = vpop.f32.mrb[39].mxu0 }
 0x2f8   : > { %v3363_v1 = vpop.eup %3362  ;;  %v1307_v2 = vadd.f32 %v4164_v0, %v1306_v63 }
 0x2f9   : > { %v3365_v3 = vpop.eup %3364  ;;  %2916 = vmatprep.mubr.f32.mxu1 %v3363_v1 }
 0x2fa   : > { %3374 = vtanh.f32 %v1307_v2  ;;  %v2850_v4 = vpop.f32.mrb[40].mxu0  ;;  %2917 = vmatmul.mubr.f32.gmra.mrb[64].mxu1 %v3365_v3 }
 0x2fb   : > { %3376 = vtanh.f32 %v1312_v62  ;;  %v1322_v5 = vadd.f32 %v2850_v4, %v4164_v0  ;;  %v1316_v6 = vpop.f32.mrb[41].mxu0 }
 0x2fc   : > { %v3367_v9 = vpop.eup %3366  ;;  %v1317_v10 = vadd.f32 %v4164_v0, %v1316_v6 }
 0x2fd   : > { %v3369_v11 = vpop.eup %3368  ;;  %2919 = vmatprep.mubr.f32.mxu1 %v3367_v9 }
 0x2fe   : > { %3378 = vtanh.f32 %v1317_v10  ;;  %v2853_v12 = vpop.f32.mrb[42].mxu0  ;;  %2920 = vmatmul.mubr.f32.gmra.mrb[66].mxu1 %v3369_v11 }
 0x2ff   : > { %3380 = vtanh.f32 %v1322_v5  ;;  %v1332_v13 = vadd.f32 %v2853_v12, %v4164_v0  ;;  %v1326_v14 = vpop.f32.mrb[43].mxu0 }
 0x300   : > { %v3371_v15 = vpop.eup %3370  ;;  %v1327_v16 = vadd.f32 %v4164_v0, %v1326_v14 }
 0x301   : > { %v3373_v17 = vpop.eup %3372  ;;  %2922 = vmatprep.mubr.f32.mxu1 %v3371_v15 }
 0x302   : > { %3382 = vtanh.f32 %v1327_v16  ;;  %v2856_v18 = vpop.f32.mrb[44].mxu0  ;;  %2923 = vmatmul.mubr.f32.gmra.mrb[68].mxu1 %v3373_v17 }
 0x303   : > { %3384 = vtanh.f32 %v1332_v13  ;;  %v1342_v19 = vadd.f32 %v2856_v18, %v4164_v0  ;;  %v1336_v20 = vpop.f32.mrb[45].mxu0 }
 0x304   : > { %v3375_v21 = vpop.eup %3374  ;;  %v1337_v22 = vadd.f32 %v4164_v0, %v1336_v20 }
 0x305   : > { %v3377_v23 = vpop.eup %3376  ;;  %2925 = vmatprep.mubr.f32.mxu1 %v3375_v21 }
 0x306   : > { %3386 = vtanh.f32 %v1337_v22  ;;  %v2859_v24 = vpop.f32.mrb[46].mxu0  ;;  %2926 = vmatmul.mubr.f32.gmra.mrb[70].mxu1 %v3377_v23 }
 0x307   : > { %3388 = vtanh.f32 %v1342_v19  ;;  %v1352_v25 = vadd.f32 %v2859_v24, %v4164_v0  ;;  %v1346_v26 = vpop.f32.mrb[47].mxu0 }
 0x308   : > { %v3379_v27 = vpop.eup %3378  ;;  %v1347_v28 = vadd.f32 %v4164_v0, %v1346_v26  ;;  %v1681_v0 = vld [vmem:[%s4660_s10 + $0x70] sm:$0xff] }
 0x309   : > { %v3381_v29 = vpop.eup %3380  ;;  %2928 = vmatprep.mubr.f32.mxu1 %v3379_v27  ;;  %v3144_v37 = vpack.c.bf16 %v1682_v36, %v1681_v0 }
 0x30a   : > { %3390 = vtanh.f32 %v1347_v28  ;;  %2929 = vmatmul.mubr.f32.gmra.mrb[72].mxu1 %v3381_v29 }
 0x30b   : > { %3392 = vtanh.f32 %v1352_v25  ;;  %3145 = vmatprep.subr.bf16.mxu0 %v3144_v37 }
 0x30c   : > { %v3383_v30 = vpop.eup %3382  ;;  %3147 = vmatpush3.bf16.msra.mxu0 %v3144_v37 }
 0x30d   : > { %v3385_v31 = vpop.eup %3384  ;;  %2931 = vmatprep.mubr.f32.mxu1 %v3383_v30 }
 0x30e   : > { %2932 = vmatmul.mubr.f32.gmra.mrb[74].mxu1 %v3385_v31 }
 0x310   : > { %v3387_v32 = vpop.eup %3386 }
 0x311   : > { %v3389_v33 = vpop.eup %3388  ;;  %2934 = vmatprep.mubr.f32.mxu1 %v3387_v32 }
 0x312   : > { %2935 = vmatmul.mubr.f32.gmra.mrb[76].mxu1 %v3389_v33 }
 0x314   : > { %v3391_v34 = vpop.eup %3390 }
 0x315   : > { %v3393_v35 = vpop.eup %3392  ;;  %2937 = vmatprep.mubr.f32.mxu1 %v3391_v34 }
 0x316   : > { %2938 = vmatmul.mubr.f32.gmra.mrb[78].mxu1 %v3393_v35 }
 0x3ad   : > { %v2894_v39 = vpop.f32.mrb[48].mxu1 }
 0x3ae   : > { %v1482_v40 = vadd.f32 %v2894_v39, %v4207_v38  ;;  %v1476_v41 = vpop.f32.mrb[49].mxu1 }
 0x3af   : > { %v1477_v7 = vadd.f32 %v4207_v38, %v1476_v41 }
 0x3b1   : > { %3394 = vtanh.f32 %v1477_v7  ;;  %v2897_v8 = vpop.f32.mrb[50].mxu1 }
 0x3b2   : > { %3396 = vtanh.f32 %v1482_v40  ;;  %v1492_v42 = vadd.f32 %v2897_v8, %v4207_v38  ;;  %v1486_v43 = vpop.f32.mrb[51].mxu1 }
 0x3b3   : > { %v1487_v44 = vadd.f32 %v4207_v38, %v1486_v43 }
 0x3b5   : > { %3398 = vtanh.f32 %v1487_v44  ;;  %v2900_v45 = vpop.f32.mrb[52].mxu1 }
 0x3b6   : > { %3400 = vtanh.f32 %v1492_v42  ;;  %v1502_v46 = vadd.f32 %v2900_v45, %v4207_v38  ;;  %v1496_v47 = vpop.f32.mrb[53].mxu1 }
 0x3b7   : > { %v1497_v48 = vadd.f32 %v4207_v38, %v1496_v47 }
 0x3b9   : > { %3402 = vtanh.f32 %v1497_v48  ;;  %v2903_v49 = vpop.f32.mrb[54].mxu1 }
 0x3ba   : > { %3404 = vtanh.f32 %v1502_v46  ;;  %v1512_v50 = vadd.f32 %v2903_v49, %v4207_v38  ;;  %v1506_v51 = vpop.f32.mrb[55].mxu1 }
 0x3bb   : > { %v3395_v52 = vpop.eup %3394  ;;  %v1507_v53 = vadd.f32 %v4207_v38, %v1506_v51 }
 0x3bc   : > { %v3397_v54 = vpop.eup %3396  ;;  %2972 = vmatprep.mubr.f32.mxu0 %v3395_v52 }
 0x3bd   : > { %3406 = vtanh.f32 %v1507_v53  ;;  %v2906_v55 = vpop.f32.mrb[56].mxu1  ;;  %2973 = vmatmul.mubr.f32.vlgmr.msra.gmra.mrb[48].mxu0 %v3397_v54 }
 0x3be   : > { %3408 = vtanh.f32 %v1512_v50  ;;  %v1522_v56 = vadd.f32 %v2906_v55, %v4207_v38  ;;  %v1516_v57 = vpop.f32.mrb[57].mxu1 }
 0x3bf   : > { %v3399_v58 = vpop.eup %3398  ;;  %v1517_v59 = vadd.f32 %v4207_v38, %v1516_v57 }
 0x3c0   : > { %v3401_v60 = vpop.eup %3400  ;;  %2975 = vmatprep.mubr.f32.mxu0 %v3399_v58 }
 0x3c1   : > { %3410 = vtanh.f32 %v1517_v59  ;;  %v2909_v61 = vpop.f32.mrb[58].mxu1  ;;  %2976 = vmatmul.mubr.f32.gmra.mrb[50].mxu0 %v3401_v60 }
 0x3c2   : > { %3412 = vtanh.f32 %v1522_v56  ;;  %v1532_v62 = vadd.f32 %v2909_v61, %v4207_v38  ;;  %v1526_v63 = vpop.f32.mrb[59].mxu1 }
 0x3c3   : > { %v3403_v1 = vpop.eup %3402  ;;  %v1527_v2 = vadd.f32 %v4207_v38, %v1526_v63 }
 0x3c4   : > { %v3405_v3 = vpop.eup %3404  ;;  %2978 = vmatprep.mubr.f32.mxu0 %v3403_v1 }
 0x3c5   : > { %3414 = vtanh.f32 %v1527_v2  ;;  %v2912_v4 = vpop.f32.mrb[60].mxu1  ;;  %2979 = vmatmul.mubr.f32.gmra.mrb[52].mxu0 %v3405_v3 }
 0x3c6   : > { %3416 = vtanh.f32 %v1532_v62  ;;  %v1542_v5 = vadd.f32 %v2912_v4, %v4207_v38  ;;  %v1536_v6 = vpop.f32.mrb[61].mxu1 }
 0x3c7   : > { %v3407_v9 = vpop.eup %3406  ;;  %v1537_v10 = vadd.f32 %v4207_v38, %v1536_v6 }
 0x3c8   : > { %v3409_v11 = vpop.eup %3408  ;;  %2981 = vmatprep.mubr.f32.mxu0 %v3407_v9 }
 0x3c9   : > { %3418 = vtanh.f32 %v1537_v10  ;;  %v2915_v12 = vpop.f32.mrb[62].mxu1  ;;  %2982 = vmatmul.mubr.f32.gmra.mrb[54].mxu0 %v3409_v11 }
 0x3ca   : > { %3420 = vtanh.f32 %v1542_v5  ;;  %v1552_v13 = vadd.f32 %v2915_v12, %v4207_v38  ;;  %v1546_v14 = vpop.f32.mrb[63].mxu1 }
 0x3cb   : > { %v3411_v15 = vpop.eup %3410  ;;  %v1547_v16 = vadd.f32 %v4207_v38, %v1546_v14 }
 0x3cc   : > { %v3413_v17 = vpop.eup %3412  ;;  %2984 = vmatprep.mubr.f32.mxu0 %v3411_v15 }
 0x3cd   : > { %3422 = vtanh.f32 %v1547_v16  ;;  %v2918_v18 = vpop.f32.mrb[64].mxu1  ;;  %2985 = vmatmul.mubr.f32.gmra.mrb[56].mxu0 %v3413_v17 }
 0x3ce   : > { %3424 = vtanh.f32 %v1552_v13  ;;  %v1562_v19 = vadd.f32 %v2918_v18, %v4207_v38  ;;  %v1556_v20 = vpop.f32.mrb[65].mxu1 }
 0x3cf   : > { %v3415_v21 = vpop.eup %3414  ;;  %v1557_v22 = vadd.f32 %v4207_v38, %v1556_v20 }
 0x3d0   : > { %v3417_v23 = vpop.eup %3416  ;;  %2987 = vmatprep.mubr.f32.mxu0 %v3415_v21 }
 0x3d1   : > { %3426 = vtanh.f32 %v1557_v22  ;;  %v2921_v24 = vpop.f32.mrb[66].mxu1  ;;  %2988 = vmatmul.mubr.f32.gmra.mrb[58].mxu0 %v3417_v23  ;;  %v1919_v22 = vlaneseq }
 0x3d2   : > { %3428 = vtanh.f32 %v1562_v19  ;;  %v1572_v25 = vadd.f32 %v2921_v24, %v4207_v38  ;;  %v1566_v26 = vpop.f32.mrb[67].mxu1 }
 0x3d3   : > { %v3419_v27 = vpop.eup %3418  ;;  %v1567_v28 = vadd.f32 %v4207_v38, %v1566_v26 }
 0x3d4   : > { %v3421_v29 = vpop.eup %3420  ;;  %2990 = vmatprep.mubr.f32.mxu0 %v3419_v27 }
 0x3d5   : > { %3430 = vtanh.f32 %v1567_v28  ;;  %v2924_v30 = vpop.f32.mrb[68].mxu1  ;;  %2991 = vmatmul.mubr.f32.gmra.mrb[60].mxu0 %v3421_v29 }
 0x3d6   : > { %3432 = vtanh.f32 %v1572_v25  ;;  %v1582_v31 = vadd.f32 %v2924_v30, %v4207_v38  ;;  %v1576_v32 = vpop.f32.mrb[69].mxu1 }
 0x3d7   : > { %v3423_v33 = vpop.eup %3422  ;;  %v1577_v34 = vadd.f32 %v4207_v38, %v1576_v32 }
 0x3d8   : > { %v3425_v35 = vpop.eup %3424  ;;  %2993 = vmatprep.mubr.f32.mxu0 %v3423_v33 }
 0x3d9   : > { %3434 = vtanh.f32 %v1577_v34  ;;  %v2927_v0 = vpop.f32.mrb[70].mxu1  ;;  %2994 = vmatmul.mubr.f32.gmra.mrb[62].mxu0 %v3425_v35 }
 0x3da   : > { %3436 = vtanh.f32 %v1582_v31  ;;  %v1592_v36 = vadd.f32 %v2927_v0, %v4207_v38  ;;  %v1586_v37 = vpop.f32.mrb[71].mxu1  ;;  %v4273_v31 = vand.u32 127, %v1919_v22 }
 0x3db   : > { %v3427_v39 = vpop.eup %3426  ;;  %v1587_v40 = vadd.f32 %v4207_v38, %v1586_v37 }
 0x3dc   : > { %v3429_v41 = vpop.eup %3428  ;;  %2996 = vmatprep.mubr.f32.mxu0 %v3427_v39  ;;  %vm2211_vm2 = vcmp.eq.s32.totalorder %v4273_v31, 1  ;;  %vm2178_vm3 = vcmp.eq.s32.totalorder %v4273_v31, 0 }
 0x3dd   : > { %3438 = vtanh.f32 %v1587_v40  ;;  %v2930_v7 = vpop.f32.mrb[72].mxu1  ;;  %2997 = vmatmul.mubr.f32.gmra.mrb[64].mxu0 %v3429_v41 }
 0x3de   : > { %3440 = vtanh.f32 %v1592_v36  ;;  %v1602_v8 = vadd.f32 %v2930_v7, %v4207_v38  ;;  %v1596_v42 = vpop.f32.mrb[73].mxu1 }
 0x3df   : > { %v3431_v43 = vpop.eup %3430  ;;  %v1597_v44 = vadd.f32 %v4207_v38, %v1596_v42  ;;  %v2213_v42 = vstv %s4264_s29  ;;  %s4609_s29 = scalar_lea.sflag [#allocation3], %s419_s15 }
 0x3e0   : > { %v3433_v45 = vpop.eup %3432  ;;  %2999 = vmatprep.mubr.f32.mxu0 %v3431_v43 }
 0x3e1   : > { %3442 = vtanh.f32 %v1597_v44  ;;  %v2933_v46 = vpop.f32.mrb[74].mxu1  ;;  %3000 = vmatmul.mubr.f32.gmra.mrb[66].mxu0 %v3433_v45 }
 0x3e2   : > { %3444 = vtanh.f32 %v1602_v8  ;;  %v1612_v47 = vadd.f32 %v2933_v46, %v4207_v38  ;;  %v1606_v48 = vpop.f32.mrb[75].mxu1  ;;  %v2212_v8 = vstv %s4261_s28  ;;  %s4600_s28 = scalar_lea.hbm %s4662_s12, %s2424_s19 }
 0x3e3   : > { %v3435_v49 = vpop.eup %3434  ;;  %v1607_v50 = vadd.f32 %v4207_v38, %v1606_v48 }
 0x3e4   : > { %v3437_v51 = vpop.eup %3436  ;;  %3002 = vmatprep.mubr.f32.mxu0 %v3435_v49 }
 0x3e5   : > { %3446 = vtanh.f32 %v1607_v50  ;;  %v2936_v52 = vpop.f32.mrb[76].mxu1  ;;  %3003 = vmatmul.mubr.f32.gmra.mrb[68].mxu0 %v3437_v51 }
 0x3e6   : > { %3448 = vtanh.f32 %v1612_v47  ;;  %v1622_v53 = vadd.f32 %v2936_v52, %v4207_v38  ;;  %v1616_v54 = vpop.f32.mrb[77].mxu1  ;;  %v2214_v52 = vsel %vm2211_vm2, %v2212_v8, %v2213_v42 }
 0x3e7   : > { %v3439_v55 = vpop.eup %3438  ;;  %v1617_v56 = vadd.f32 %v4207_v38, %v1616_v54 }
 0x3e8   : > { %v3441_v57 = vpop.eup %3440  ;;  %3005 = vmatprep.mubr.f32.mxu0 %v3439_v55 }
 0x3e9   : > { %3450 = vtanh.f32 %v1617_v56  ;;  %v2939_v58 = vpop.f32.mrb[78].mxu1  ;;  %3006 = vmatmul.mubr.f32.gmra.mrb[70].mxu0 %v3441_v57  ;;  %v2215_v56 = vstv %s4276_s16  ;;  %s3601_s16 = scalar_lea.vmem %s4602_s20, 4096 }
 0x3ea   : > { %3452 = vtanh.f32 %v1622_v53  ;;  %v1632_v59 = vadd.f32 %v2939_v58, %v4207_v38  ;;  %v1626_v60 = vpop.f32.mrb[79].mxu1  ;;  %p3602_p9 = scmp.ne.s32.totalorder %s4602_s20, %s3601_s16 }
 0x3eb   : > { %v3443_v61 = vpop.eup %3442  ;;  %v1627_v62 = vadd.f32 %v4207_v38, %v1626_v60  ;;  %v4244_v38 = vld [vmem:[%s4661_s11] ss:$0 sm:$0xff] }
 0x3ec   : > { %v3445_v63 = vpop.eup %3444  ;;  %3008 = vmatprep.mubr.f32.mxu0 %v3443_v61  ;;  %p3603_p11 = pnand %p3602_p9, %p3776_p5 }
 0x3ed   : > { %3454 = vtanh.f32 %v1627_v62  ;;  %3009 = vmatmul.mubr.f32.gmra.mrb[72].mxu0 %v3445_v63 }
 0x3ee   : > { %3456 = vtanh.f32 %v1632_v59  ;;  %p3604_p12 = pneg %p3603_p11 }
 0x3ef   : > { %v3447_v1 = vpop.eup %3446 }
 0x3f0   : > { %v3449_v2 = vpop.eup %3448  ;;  %3011 = vmatprep.mubr.f32.mxu0 %v3447_v1 }
 0x3f1   : > { %3012 = vmatmul.mubr.f32.gmra.mrb[74].mxu0 %v3449_v2 }
 0x3f3   : > { %v3451_v3 = vpop.eup %3450 }
 0x3f4   : > { %v3453_v4 = vpop.eup %3452  ;;  %3014 = vmatprep.mubr.f32.mxu0 %v3451_v3  ;;  %v4311_v3 = vstv %s4285_s17  ;;  %s3670_s17 = smov [#allocation5]  }
 0x3f5   : > { %3015 = vmatmul.mubr.f32.gmra.mrb[76].mxu0 %v3453_v4  ;;  %s3605_s18 = sshll.u32 %s3670_s17, 4  ;;  %s3606_s18 = int_to_ptr.vmem [resolvable:$false] %s3605_s18 }
 0x3f6   : > { %s3607_s19 = scalar_lea.vmem %s3606_s18, 8192  ;;  %p3608_p13 = scmp.lt.s32.totalorder %s4602_s20, %s3606_s18 }
 0x3f7   : > { %v3455_v5 = vpop.eup %3454  ;;  %p3609_p0 = scmp.lt.s32.totalorder %s3607_s19, %s3601_s16 }
 0x3f8   : > { %v3457_v6 = vpop.eup %3456  ;;  %3017 = vmatprep.mubr.f32.mxu0 %v3455_v5 }
 0x3f9   : > { %3018 = vmatmul.mubr.f32.gmra.mrb[78].mxu0 %v3457_v6  ;;  %p3610_p1 = por %p3609_p0, %p3608_p13 }
 0x3fb   : > { %p3611_p2 = pnand %p3610_p1, %p3604_p12 }
 0x490   : > { %v2974_v9 = vpop.f32.mrb[48].mxu0 }
 0x491   : > { %v4247_v10 = vadd.f32 %v2974_v9, %v4244_v38  ;;  %v1756_v11 = vpop.f32.mrb[49].mxu0  ;;  %v4316_v9 = vsel %vm2178_vm3, %v2215_v56, %v2214_v52 }
 0x492   : > { %v4250_v12 = vadd.f32 %v4244_v38, %v1756_v11 }
 0x493   : > { %v1922_v13 = vmul.f32 -0.5, %v4247_v10 }
 0x494   : > { %v1921_v14 = vmul.f32 -0.5, %v4250_v12  ;;  %v2977_v15 = vpop.f32.mrb[50].mxu0 }
 0x495   : > { %v1955_v16 = vmul.f32 1.442695, %v1922_v13  ;;  %v4255_v17 = vadd.f32 %v2977_v15, %v4244_v38  ;;  %v1766_v18 = vpop.f32.mrb[51].mxu0 }
 0x496   : > { %v1953_v19 = vmul.f32 1.442695, %v1921_v14  ;;  %v4258_v20 = vadd.f32 %v4244_v38, %v1766_v18 }
 0x497   : > { %3458 = vpow2.f32 %v1955_v16  ;;  %v1924_v21 = vmul.f32 -0.5, %v4255_v17 }
 0x498   : > { %3460 = vpow2.f32 %v1953_v19  ;;  %v1923_v23 = vmul.f32 -0.5, %v4258_v20  ;;  %v2980_v24 = vpop.f32.mrb[52].mxu0 }
 0x499   : > { %v1959_v25 = vmul.f32 1.442695, %v1924_v21  ;;  %v4267_v26 = vadd.f32 %v2980_v24, %v4244_v38  ;;  %v1776_v27 = vpop.f32.mrb[53].mxu0  ;;  %v2147_v21 = vmax.f32 %v4247_v10, 0.0  ;;  %v2146_v24 = vmax.f32 %v4250_v12, 0.0 }
 0x49a   : > { %v1957_v28 = vmul.f32 1.442695, %v1923_v23  ;;  %v4270_v29 = vadd.f32 %v4244_v38, %v1776_v27 }
 0x49b   : > { %3462 = vpow2.f32 %v1959_v25  ;;  %v1926_v30 = vmul.f32 -0.5, %v4267_v26  ;;  %v2149_v25 = vmax.f32 %v4255_v17, 0.0 }
 0x49c   : > { %3464 = vpow2.f32 %v1957_v28  ;;  %v1925_v32 = vmul.f32 -0.5, %v4270_v29  ;;  %v2983_v33 = vpop.f32.mrb[54].mxu0  ;;  %v2150_v42 = vmax.f32 %v4270_v29, 0.0 }
 0x49d   : > { %v1963_v34 = vmul.f32 1.442695, %v1926_v30  ;;  %v4279_v35 = vadd.f32 %v2983_v33, %v4244_v38  ;;  %v1786_v0 = vpop.f32.mrb[55].mxu0 }
 0x49e   : > { %v1961_v36 = vmul.f32 1.442695, %v1925_v32  ;;  %v4282_v37 = vadd.f32 %v4244_v38, %v1786_v0  ;;  %v2148_v32 = vmax.f32 %v4258_v20, 0.0  ;;  %v2151_v20 = vmax.f32 %v4267_v26, 0.0 }
 0x49f   : > { %3466 = vpow2.f32 %v1963_v34  ;;  %v1928_v39 = vmul.f32 -0.5, %v4279_v35 }
 0x4a0   : > { %3468 = vpow2.f32 %v1961_v36  ;;  %v1927_v40 = vmul.f32 -0.5, %v4282_v37  ;;  %v2986_v41 = vpop.f32.mrb[56].mxu0 }
 0x4a1   : > { %v3459_v7 = vpop.eup %3458  ;;  %v1967_v43 = vmul.f32 1.442695, %v1928_v39  ;;  %v4292_v44 = vadd.f32 %v2986_v41, %v4244_v38  ;;  %v1796_v45 = vpop.f32.mrb[57].mxu0 }
 0x4a2   : > { %v3461_v46 = vpop.eup %3460  ;;  %v2018_v47 = vadd.f32 1.0, %v3459_v7  ;;  %v1965_v48 = vmul.f32 1.442695, %v1927_v40  ;;  %v4295_v49 = vadd.f32 %v4244_v38, %v1796_v45 }
 0x4a3   : > { %v2017_v50 = vadd.f32 1.0, %v3461_v46  ;;  %3470 = vpow2.f32 %v1967_v43  ;;  %v1930_v51 = vmul.f32 -0.5, %v4292_v44 }
 0x4a4   : > { %3472 = vrcp.f32 %v2018_v47  ;;  %v1929_v53 = vmul.f32 -0.5, %v4295_v49  ;;  %v2989_v54 = vpop.f32.mrb[58].mxu0 }
 0x4a5   : > { %v3463_v55 = vpop.eup %3462  ;;  %3474 = vrcp.f32 %v2017_v50  ;;  %v1971_v57 = vmul.f32 1.442695, %v1930_v51  ;;  %v4304_v58 = vadd.f32 %v2989_v54, %v4244_v38  ;;  %v1806_v59 = vpop.f32.mrb[59].mxu0 }
 0x4a6   : > { %v3465_v60 = vpop.eup %3464  ;;  %v2020_v61 = vadd.f32 1.0, %v3463_v55  ;;  %3476 = vpow2.f32 %v1965_v48  ;;  %v1969_v62 = vmul.f32 1.442695, %v1929_v53  ;;  %v4307_v63 = vadd.f32 %v4244_v38, %v1806_v59 }
 0x4a7   : > { %v2019_v1 = vadd.f32 1.0, %v3465_v60  ;;  %3478 = vpow2.f32 %v1971_v57  ;;  %v1932_v2 = vmul.f32 -0.5, %v4304_v58 }
 0x4a8   : > { %3480 = vrcp.f32 %v2020_v61  ;;  %v1931_v4 = vmul.f32 -0.5, %v4307_v63  ;;  %v2992_v5 = vpop.f32.mrb[60].mxu0 }
 0x4a9   : > { %v3467_v6 = vpop.eup %3466  ;;  %3482 = vrcp.f32 %v2019_v1  ;;  %v1975_v11 = vmul.f32 1.442695, %v1932_v2  ;;  %v4319_v13 = vadd.f32 %v2992_v5, %v4244_v38  ;;  %v1816_v14 = vpop.f32.mrb[61].mxu0 }
 0x4aa   : > { %v3469_v15 = vpop.eup %3468  ;;  %v2022_v16 = vadd.f32 1.0, %v3467_v6  ;;  %3484 = vpow2.f32 %v1969_v62  ;;  %v1973_v18 = vmul.f32 1.442695, %v1931_v4  ;;  %v4322_v19 = vadd.f32 %v4244_v38, %v1816_v14 }
 0x4ab   : > { %v2021_v22 = vadd.f32 1.0, %v3469_v15  ;;  %3486 = vpow2.f32 %v1975_v11  ;;  %v1934_v23 = vmul.f32 -0.5, %v4319_v13  ;;  %v2153_v62 = vmax.f32 %v4279_v35, 0.0 }
 0x4ac   : > { %3488 = vrcp.f32 %v2022_v16  ;;  %v1933_v27 = vmul.f32 -0.5, %v4322_v19  ;;  %v2995_v28 = vpop.f32.mrb[62].mxu0 }
 0x4ad   : > { %v3471_v30 = vpop.eup %3470  ;;  %3490 = vrcp.f32 %v2021_v22  ;;  %v1979_v33 = vmul.f32 1.442695, %v1934_v23  ;;  %v4332_v10 = vadd.f32 %v2995_v28, %v4244_v38  ;;  %v1826_v34 = vpop.f32.mrb[63].mxu0  ;;  %v2152_v28 = vmax.f32 %v4282_v37, 0.0 }
 0x4ae   : > { %v3473_v0 = vpop.eup %3472  ;;  %v2024_v12 = vadd.f32 1.0, %v3471_v30  ;;  %3492 = vpow2.f32 %v1973_v18  ;;  %v1977_v17 = vmul.f32 1.442695, %v1933_v27  ;;  %v4339_v36 = vadd.f32 %v4244_v38, %v1826_v34 }
 0x4af   : > { %v3475_v39 = vpop.eup %3474  ;;  %v2115_v40 = vmul.f32 %v3473_v0, %v4311_v3  ;;  %3494 = vpow2.f32 %v1979_v33  ;;  %v1936_v41 = vmul.f32 -0.5, %v4332_v10  ;;  %v2155_v0 = vmax.f32 %v4292_v44, 0.0 }
 0x4b0   : > { %v3477_v7 = vpop.eup %3476  ;;  %v2114_v8 = vmul.f32 %v3475_v39, %v4311_v3  ;;  %3496 = vrcp.f32 %v2024_v12  ;;  %v1935_v43 = vmul.f32 -0.5, %v4339_v36  ;;  %v2998_v45 = vpop.f32.mrb[64].mxu0 }
 0x4b1   : > { %v3479_v46 = vpop.eup %3478  ;;  %v2180_v47 = vsel %vm2178_vm3, %v2115_v40, %v2147_v21  ;;  %v2023_v48 = vadd.f32 1.0, %v3477_v7  ;;  %3498 = vpow2.f32 %v1977_v17  ;;  %v1983_v26 = vmul.f32 1.442695, %v1936_v41  ;;  %v1836_v50 = vpop.f32.mrb[65].mxu0 }
 0x4b2   : > { %v3481_v51 = vpop.eup %3480  ;;  %v2218_v52 = vmul.f32 %v4316_v9, %v2180_v47  ;;  %v2179_v53 = vsel %vm2178_vm3, %v2114_v8, %v2146_v24  ;;  %v2026_v29 = vadd.f32 1.0, %v3479_v46  ;;  %v1981_v54 = vmul.f32 1.442695, %v1935_v43 }
 0x4b3   : > { %v3483_v55 = vpop.eup %3482  ;;  %v2217_v56 = vmul.f32 %v4316_v9, %v2179_v53  ;;  %v2117_v57 = vmul.f32 %v3481_v51, %v4311_v3  ;;  %3500 = vrcp.f32 %v2023_v48  ;;  %v4355_v59 = vadd.f32 %v2998_v45, %v4244_v38 }
 0x4b4   : > { %v3485_v60 = vpop.eup %3484  ;;  %2250 = vst [vmem:[%s4358_s0 + $0x8] sm:$0xff] %v2218_v52  ;;  %v2116_v61 = vmul.f32 %v3483_v55, %v4311_v3  ;;  %3502 = vrcp.f32 %v2026_v29  ;;  %v4364_v1 = vadd.f32 %v4244_v38, %v1836_v50  ;;  %v3001_v2 = vpop.f32.mrb[66].mxu0  ;;  %v2154_v50 = vmax.f32 %v4295_v49, 0.0 }
 0x4b5   : > { %v3487_v4 = vpop.eup %3486  ;;  %2249 = vst [vmem:[%s4358_s0] sm:$0xff] %v2217_v56  ;;  %v2182_v5 = vsel %vm2178_vm3, %v2117_v57, %v2149_v25  ;;  %v2025_v6 = vadd.f32 1.0, %v3485_v60  ;;  %3504 = vpow2.f32 %v1983_v26  ;;  %v1938_v11 = vmul.f32 -0.5, %v4355_v59  ;;  %v1846_v14 = vpop.f32.mrb[67].mxu0 }
 0x4b6   : > { %v3489_v15 = vpop.eup %3488  ;;  %v2220_v16 = vmul.f32 %v4316_v9, %v2182_v5  ;;  %v2181_v35 = vsel %vm2178_vm3, %v2116_v61, %v2148_v32  ;;  %v2028_v18 = vadd.f32 1.0, %v3487_v4  ;;  %3506 = vpow2.f32 %v1981_v54 }
 0x4b7   : > { %v3491_v21 = vpop.eup %3490  ;;  %v2219_v22 = vmul.f32 %v4316_v9, %v2181_v35  ;;  %v2119_v23 = vmul.f32 %v3489_v15, %v4311_v3  ;;  %3508 = vrcp.f32 %v2025_v6  ;;  %v1987_v24 = vmul.f32 1.442695, %v1938_v11 }
 0x4b8   : > { %v3493_v25 = vpop.eup %3492  ;;  %2252 = vst [vmem:[%s4358_s0 + $0x18] sm:$0xff] %v2220_v16  ;;  %v2118_v27 = vmul.f32 %v3491_v21, %v4311_v3  ;;  %3510 = vrcp.f32 %v2028_v18  ;;  %v1937_v30 = vmul.f32 -0.5, %v4364_v1  ;;  %v3004_v32 = vpop.f32.mrb[68].mxu0  ;;  %v4389_v44 = vadd.f32 %v3001_v2, %v4244_v38 }
 0x4b9   : > { %v3495_v33 = vpop.eup %3494  ;;  %2251 = vst [vmem:[%s4358_s0 + $0x10] sm:$0xff] %v2219_v22  ;;  %v2184_v34 = vsel %vm2178_vm3, %v2119_v23, %v2151_v20  ;;  %v2027_v12 = vadd.f32 1.0, %v3493_v25  ;;  %3512 = vpow2.f32 %v1987_v24  ;;  %v1856_v17 = vpop.f32.mrb[69].mxu0  ;;  %v4393_v46 = vadd.f32 %v4244_v38, %v1846_v14 }
 0x4ba   : > { %v3497_v39 = vpop.eup %3496  ;;  %v2222_v40 = vmul.f32 %v4316_v9, %v2184_v34  ;;  %v2183_v37 = vsel %vm2178_vm3, %v2118_v27, %v2150_v42  ;;  %v2030_v41 = vadd.f32 1.0, %v3495_v33  ;;  %v1985_v7 = vmul.f32 1.442695, %v1937_v30 }
 0x4bb   : > { %v3499_v8 = vpop.eup %3498  ;;  %v2221_v43 = vmul.f32 %v4316_v9, %v2183_v37  ;;  %v2121_v45 = vmul.f32 %v3497_v39, %v4311_v3  ;;  %3514 = vrcp.f32 %v2027_v12  ;;  %v4396_v47 = vadd.f32 %v3004_v32, %v4244_v38 }
 0x4bc   : > { %2254 = vst [vmem:[%s4358_s0 + $0x28] sm:$0xff] %v2222_v40  ;;  %3516 = vrcp.f32 %v2030_v41  ;;  %v2029_v20 = vadd.f32 1.0, %v3499_v8  ;;  %v3007_v42 = vpop.f32.mrb[70].mxu0  ;;  %v1940_v51 = vmul.f32 -0.5, %v4389_v44  ;;  %v1939_v55 = vmul.f32 -0.5, %v4393_v46 }
 0x4bd   : > { %v3501_v48 = vpop.eup %3500  ;;  %2253 = vst [vmem:[%s4358_s0 + $0x20] sm:$0xff] %v2221_v43  ;;  %v2186_v26 = vsel %vm2178_vm3, %v2121_v45, %v2153_v62  ;;  %3518 = vpow2.f32 %v1985_v7  ;;  %v1866_v52 = vpop.f32.mrb[71].mxu0  ;;  %v2157_v60 = vmax.f32 %v4304_v58, 0.0  ;;  %v1942_v49 = vmul.f32 -0.5, %v4396_v47 }
 0x4be   : > { %v3503_v53 = vpop.eup %3502  ;;  %v2224_v29 = vmul.f32 %v4316_v9, %v2186_v26  ;;  %v2120_v54 = vmul.f32 %v3501_v48, %v4311_v3  ;;  %3520 = vrcp.f32 %v2029_v20  ;;  %v1991_v61 = vmul.f32 1.442695, %v1940_v51 }
 0x4bf   : > { %v3505_v56 = vpop.eup %3504  ;;  %v2123_v57 = vmul.f32 %v3503_v53, %v4311_v3  ;;  %v2156_v4 = vmax.f32 %v4307_v63, 0.0  ;;  %v1989_v6 = vmul.f32 1.442695, %v1939_v55  ;;  %v1995_v63 = vmul.f32 1.442695, %v1942_v49 }
 0x4c0   : > { %v3507_v62 = vpop.eup %3506  ;;  %2256 = vst [vmem:[%s4358_s0 + $0x38] sm:$0xff] %v2224_v29  ;;  %v2185_v2 = vsel %vm2178_vm3, %v2120_v54, %v2152_v28  ;;  %v2032_v5 = vadd.f32 1.0, %v3505_v56  ;;  %v3010_v11 = vpop.f32.mrb[72].mxu0  ;;  %3522 = vpow2.f32 %v1991_v61  ;;  %v4421_v25 = vadd.f32 %v4244_v38, %v1856_v17 }
 0x4c1   : > { %v3509_v14 = vpop.eup %3508  ;;  %v2223_v15 = vmul.f32 %v4316_v9, %v2185_v2  ;;  %v2188_v58 = vsel %vm2178_vm3, %v2123_v57, %v2155_v0  ;;  %v2031_v16 = vadd.f32 1.0, %v3507_v62  ;;  %v1876_v35 = vpop.f32.mrb[73].mxu0  ;;  %v4424_v27 = vadd.f32 %v3007_v42, %v4244_v38 }
 0x4c2   : > { %v3511_v18 = vpop.eup %3510  ;;  %v2226_v21 = vmul.f32 %v4316_v9, %v2188_v58  ;;  %v2122_v22 = vmul.f32 %v3509_v14, %v4311_v3  ;;  %3524 = vrcp.f32 %v2032_v5  ;;  %v4430_v32 = vadd.f32 %v4244_v38, %v1866_v52 }
 0x4c3   : > { %v3513_v23 = vpop.eup %3512  ;;  %2255 = vst [vmem:[%s4358_s0 + $0x30] sm:$0xff] %v2223_v15  ;;  %v2125_v24 = vmul.f32 %v3511_v18, %v4311_v3  ;;  %3526 = vrcp.f32 %v2031_v16  ;;  %v1941_v17 = vmul.f32 -0.5, %v4421_v25  ;;  %v2159_v7 = vmax.f32 %v4319_v13, 0.0 }
 0x4c4   : > { %2258 = vst [vmem:[%s4358_s0 + $0x48] sm:$0xff] %v2226_v21  ;;  %v2187_v28 = vsel %vm2178_vm3, %v2122_v22, %v2154_v50  ;;  %v2034_v30 = vadd.f32 1.0, %v3513_v23  ;;  %3528 = vpow2.f32 %v1989_v6  ;;  %v3013_v33 = vpop.f32.mrb[74].mxu0  ;;  %v2158_v45 = vmax.f32 %v4322_v19, 0.0 }
 0x4c5   : > { %v3515_v34 = vpop.eup %3514  ;;  %v2225_v0 = vmul.f32 %v4316_v9, %v2187_v28  ;;  %v2190_v12 = vsel %vm2178_vm3, %v2125_v24, %v2157_v60  ;;  %3530 = vpow2.f32 %v1995_v63  ;;  %v1886_v39 = vpop.f32.mrb[75].mxu0  ;;  %v1993_v20 = vmul.f32 1.442695, %v1941_v17 }
 0x4c6   : > { %v3517_v40 = vpop.eup %3516  ;;  %v2228_v37 = vmul.f32 %v4316_v9, %v2190_v12  ;;  %v2124_v41 = vmul.f32 %v3515_v34, %v4311_v3  ;;  %3532 = vrcp.f32 %v2034_v30  ;;  %v1944_v42 = vmul.f32 -0.5, %v4424_v27 }
 0x4c7   : > { %v3519_v8 = vpop.eup %3518  ;;  %2257 = vst [vmem:[%s4358_s0 + $0x40] sm:$0xff] %v2225_v0  ;;  %v2127_v43 = vmul.f32 %v3517_v40, %v4311_v3  ;;  %v2161_v50 = vmax.f32 %v4332_v10, 0.0  ;;  %v1943_v13 = vmul.f32 -0.5, %v4430_v32  ;;  %3534 = vpow2.f32 %v1993_v20 }
 0x4c8   : > { %v3521_v48 = vpop.eup %3520  ;;  %2260 = vst [vmem:[%s4358_s0 + $0x58] sm:$0xff] %v2228_v37  ;;  %v2189_v26 = vsel %vm2178_vm3, %v2124_v41, %v2156_v4  ;;  %v2033_v51 = vadd.f32 1.0, %v3519_v8  ;;  %v3016_v52 = vpop.f32.mrb[76].mxu0  ;;  %v1999_v56 = vmul.f32 1.442695, %v1944_v42  ;;  %v4457_v61 = vadd.f32 %v3010_v11, %v4244_v38 }
 0x4c9   : > { %v2227_v53 = vmul.f32 %v4316_v9, %v2189_v26  ;;  %v2192_v19 = vsel %vm2178_vm3, %v2127_v43, %v2159_v7  ;;  %v2126_v29 = vmul.f32 %v3521_v48, %v4311_v3  ;;  %v1896_v54 = vpop.f32.mrb[77].mxu0  ;;  %v1997_v57 = vmul.f32 1.442695, %v1943_v13 }
 0x4ca   : > { %v2230_v55 = vmul.f32 %v4316_v9, %v2192_v19  ;;  %3536 = vrcp.f32 %v2033_v51  ;;  %v3523_v10 = vpop.eup %3522  ;;  %v4460_v49 = vadd.f32 %v4244_v38, %v1876_v35  ;;  %v4463_v62 = vadd.f32 %v3013_v33, %v4244_v38 }
 0x4cb   : > { %2259 = vst [vmem:[%s4358_s0 + $0x50] sm:$0xff] %v2227_v53  ;;  %v2191_v60 = vsel %vm2178_vm3, %v2126_v29, %v2158_v45  ;;  %v2160_v5 = vmax.f32 %v4339_v36, 0.0  ;;  %v2036_v6 = vadd.f32 1.0, %v3523_v10  ;;  %3538 = vpow2.f32 %v1999_v56 }
 0x4cc   : > { %v3525_v2 = vpop.eup %3524  ;;  %2262 = vst [vmem:[%s4358_s0 + $0x68] sm:$0xff] %v2230_v55  ;;  %v2229_v4 = vmul.f32 %v4316_v9, %v2191_v60  ;;  %v3019_v14 = vpop.f32.mrb[78].mxu0  ;;  %v2163_v58 = vmax.f32 %v4355_v59, 0.0  ;;  %3540 = vpow2.f32 %v1997_v57  ;;  %v1946_v16 = vmul.f32 -0.5, %v4457_v61 }
 0x4cd   : > { %v3527_v15 = vpop.eup %3526  ;;  %v2129_v11 = vmul.f32 %v3525_v2, %v4311_v3  ;;  %v1906_v35 = vpop.f32.mrb[79].mxu0  ;;  %3542 = vrcp.f32 %v2036_v6  ;;  %v1945_v22 = vmul.f32 -0.5, %v4460_v49  ;;  %v4475_v36 = vadd.f32 %v4244_v38, %v1886_v39 }
 0x4ce   : > { %v3529_v18 = vpop.eup %3528  ;;  %2261 = vst [vmem:[%s4358_s0 + $0x60] sm:$0xff] %v2229_v4  ;;  %v2128_v21 = vmul.f32 %v3527_v15, %v4311_v3  ;;  %v2003_v24 = vmul.f32 1.442695, %v1946_v16  ;;  %v1948_v28 = vmul.f32 -0.5, %v4463_v62  ;;  %v4491_v8 = vadd.f32 %v3016_v52, %v4244_v38 }
 0x4cf   : > { %v3531_v63 = vpop.eup %3530  ;;  %v2194_v23 = vsel %vm2178_vm3, %v2129_v11, %v2161_v50  ;;  %v2035_v59 = vadd.f32 1.0, %v3529_v18  ;;  %v2001_v12 = vmul.f32 1.442695, %v1945_v22  ;;  %v1947_v37 = vmul.f32 -0.5, %v4475_v36 }
 0x4d0   : > { %v3533_v30 = vpop.eup %3532  ;;  %v2232_v33 = vmul.f32 %v4316_v9, %v2194_v23  ;;  %v2193_v34 = vsel %vm2178_vm3, %v2128_v21, %v2160_v5  ;;  %v2038_v0 = vadd.f32 1.0, %v3531_v63  ;;  %v2007_v40 = vmul.f32 1.442695, %v1948_v28 }
 0x4d1   : > { %v2231_v17 = vmul.f32 %v4316_v9, %v2193_v34  ;;  %v2131_v39 = vmul.f32 %v3533_v30, %v4311_v3  ;;  %3544 = vrcp.f32 %v2035_v59  ;;  %v3535_v41 = vpop.eup %3534  ;;  %v4494_v43 = vadd.f32 %v4244_v38, %v1896_v54 }
 0x4d2   : > { %2264 = vst [vmem:[%s4358_s0 + $0x78] sm:$0xff] %v2232_v33  ;;  %3546 = vrcp.f32 %v2038_v0  ;;  %v2037_v42 = vadd.f32 1.0, %v3535_v41  ;;  %v2005_v48 = vmul.f32 1.442695, %v1947_v37  ;;  %v2162_v50 = vmax.f32 %v4364_v1, 0.0 }
 0x4d3   : > { %2263 = vst [vmem:[%s4358_s0 + $0x70] sm:$0xff] %v2231_v17  ;;  %v2196_v7 = vsel %vm2178_vm3, %v2131_v39, %v2163_v58  ;;  %3548 = vpow2.f32 %v2003_v24  ;;  %v1950_v51 = vmul.f32 -0.5, %v4491_v8  ;;  %v1949_v52 = vmul.f32 -0.5, %v4494_v43 }
 0x4d4   : > { %v3537_v45 = vpop.eup %3536  ;;  %v2234_v20 = vmul.f32 %v4316_v9, %v2196_v7  ;;  %3550 = vpow2.f32 %v2001_v12  ;;  %v4503_v53 = vadd.f32 %v3019_v14, %v4244_v38  ;;  %v2165_v4 = vmax.f32 %v4389_v44, 0.0 }
 0x4d5   : > { %v2130_v26 = vmul.f32 %v3537_v45, %v4311_v3  ;;  %3552 = vpow2.f32 %v2007_v40  ;;  %v3539_v13 = vpop.eup %3538  ;;  %v2011_v55 = vmul.f32 1.442695, %v1950_v51  ;;  %v2009_v10 = vmul.f32 1.442695, %v1949_v52 }
 0x4d6   : > { %2266 = vst [vmem:[%s4358_s0 + $0x88] sm:$0xff] %v2234_v20  ;;  %3554 = vrcp.f32 %v2037_v42  ;;  %v3541_v19 = vpop.eup %3540  ;;  %v2040_v54 = vadd.f32 1.0, %v3539_v13  ;;  %v1952_v60 = vmul.f32 -0.5, %v4503_v53  ;;  %v4512_v5 = vadd.f32 %v4244_v38, %v1906_v35 }
 0x4d7   : > { %v2195_v29 = vsel %vm2178_vm3, %v2130_v26, %v2162_v50  ;;  %3556 = vpow2.f32 %v2005_v48  ;;  %v3543_v1 = vpop.eup %3542  ;;  %v2039_v57 = vadd.f32 1.0, %v3541_v19  ;;  %v2164_v18 = vmax.f32 %v4393_v46, 0.0 }
 0x4d8   : > { %v2233_v56 = vmul.f32 %v4316_v9, %v2195_v29  ;;  %v2133_v2 = vmul.f32 %v3543_v1, %v4311_v3  ;;  %3558 = vrcp.f32 %v2040_v54  ;;  %v2015_v6 = vmul.f32 1.442695, %v1952_v60 }
 0x4d9   : > { %3560 = vrcp.f32 %v2039_v57  ;;  %v1951_v11 = vmul.f32 -0.5, %v4512_v5  ;;  %v2167_v21 = vmax.f32 %v4396_v47, 0.0  ;;  %v2166_v17 = vmax.f32 %v4421_v25, 0.0 }
 0x4da   : > { %2265 = vst [vmem:[%s4358_s0 + $0x80] sm:$0xff] %v2233_v56  ;;  %v2198_v15 = vsel %vm2178_vm3, %v2133_v2, %v2165_v4  ;;  %3562 = vpow2.f32 %v2011_v55  ;;  %v2169_v20 = vmax.f32 %v4424_v27, 0.0  ;;  %v2168_v48 = vmax.f32 %v4430_v32, 0.0 }
 0x4db   : > { %v3545_v14 = vpop.eup %3544  ;;  %v2236_v16 = vmul.f32 %v4316_v9, %v2198_v15  ;;  %3564 = vpow2.f32 %v2009_v10  ;;  %v2013_v22 = vmul.f32 1.442695, %v1951_v11  ;;  %v2171_v10 = vmax.f32 %v4457_v61, 0.0 }
 0x4dc   : > { %v3547_v58 = vpop.eup %3546  ;;  %v2132_v44 = vmul.f32 %v3545_v14, %v4311_v3  ;;  %3566 = vpow2.f32 %v2015_v6  ;;  %v2170_v4 = vmax.f32 %v4460_v49, 0.0  ;;  %v2173_v15 = vmax.f32 %v4463_v62, 0.0 }
 0x4dd   : > { %v3549_v38 = vpop.eup %3548  ;;  %v2135_v35 = vmul.f32 %v3547_v58, %v4311_v3  ;;  %2268 = vst [vmem:[%s4358_s0 + $0x98] sm:$0xff] %v2236_v16  ;;  %3568 = vpow2.f32 %v2013_v22 }
 0x4de   : > { %v3551_v63 = vpop.eup %3550  ;;  %v2197_v23 = vsel %vm2178_vm3, %v2132_v44, %v2164_v18  ;;  %v2042_v59 = vadd.f32 1.0, %v3549_v38  ;;  %v2172_v18 = vmax.f32 %v4475_v36, 0.0 }
 0x4df   : > { %v3553_v24 = vpop.eup %3552  ;;  %v2235_v28 = vmul.f32 %v4316_v9, %v2197_v23  ;;  %v2200_v46 = vsel %vm2178_vm3, %v2135_v35, %v2167_v21  ;;  %v2041_v30 = vadd.f32 1.0, %v3551_v63  ;;  %v2175_v23 = vmax.f32 %v4491_v8, 0.0 }
 0x4e0   : > { %v3555_v33 = vpop.eup %3554  ;;  %v2238_v47 = vmul.f32 %v4316_v9, %v2200_v46  ;;  %3570 = vrcp.f32 %v2042_v59  ;;  %v2044_v34 = vadd.f32 1.0, %v3553_v24  ;;  %v2174_v24 = vmax.f32 %v4494_v43, 0.0 }
 0x4e1   : > { %v3557_v0 = vpop.eup %3556  ;;  %2267 = vst [vmem:[%s4358_s0 + $0x90] sm:$0xff] %v2235_v28  ;;  %v2134_v12 = vmul.f32 %v3555_v33, %v4311_v3  ;;  %3572 = vrcp.f32 %v2041_v30  ;;  %v2177_v30 = vmax.f32 %v4503_v53, 0.0  ;;  %v2176_v53 = vmax.f32 %v4512_v5, 0.0 }
 0x4e2   : > { %2270 = vst [vmem:[%s4358_s0 + $0xa8] sm:$0xff] %v2238_v47  ;;  %3574 = vrcp.f32 %v2044_v34  ;;  %v2043_v39 = vadd.f32 1.0, %v3557_v0  ;;  %v3559_v40 = vpop.eup %3558 }
 0x4e3   : > { %v2199_v37 = vsel %vm2178_vm3, %v2134_v12, %v2166_v17  ;;  %v3561_v41 = vpop.eup %3560  ;;  %v2137_v45 = vmul.f32 %v3559_v40, %v4311_v3 }
 0x4e4   : > { %v2237_v7 = vmul.f32 %v4316_v9, %v2199_v37  ;;  %3576 = vrcp.f32 %v2043_v39  ;;  %v3563_v42 = vpop.eup %3562  ;;  %v2136_v25 = vmul.f32 %v3561_v41, %v4311_v3 }
 0x4e5   : > { %v3565_v26 = vpop.eup %3564  ;;  %v2202_v50 = vsel %vm2178_vm3, %v2137_v45, %v2169_v20  ;;  %v2046_v51 = vadd.f32 1.0, %v3563_v42 }
 0x4e6   : > { %2269 = vst [vmem:[%s4358_s0 + $0xa0] sm:$0xff] %v2237_v7  ;;  %v3567_v13 = vpop.eup %3566  ;;  %v2240_v52 = vmul.f32 %v4316_v9, %v2202_v50  ;;  %v2201_v27 = vsel %vm2178_vm3, %v2136_v25, %v2168_v48  ;;  %v2045_v19 = vadd.f32 1.0, %v3565_v26 }
 0x4e7   : > { %v2239_v29 = vmul.f32 %v4316_v9, %v2201_v27  ;;  %3578 = vrcp.f32 %v2046_v51  ;;  %v2048_v54 = vadd.f32 1.0, %v3567_v13  ;;  %v3569_v55 = vpop.eup %3568 }
 0x4e8   : > { %2272 = vst [vmem:[%s4358_s0 + $0xb8] sm:$0xff] %v2240_v52  ;;  %3580 = vrcp.f32 %v2045_v19  ;;  %v2047_v1 = vadd.f32 1.0, %v3569_v55 }
 0x4e9   : > { %2271 = vst [vmem:[%s4358_s0 + $0xb0] sm:$0xff] %v2239_v29  ;;  %3582 = vrcp.f32 %v2048_v54 }
 0x4ea   : > { %v3571_v32 = vpop.eup %3570  ;;  %3584 = vrcp.f32 %v2047_v1 }
 0x4eb   : > { %v3573_v56 = vpop.eup %3572  ;;  %v2139_v57 = vmul.f32 %v3571_v32, %v4311_v3 }
 0x4ec   : > { %v3575_v60 = vpop.eup %3574  ;;  %v2138_v2 = vmul.f32 %v3573_v56, %v4311_v3 }
 0x4ed   : > { %v2204_v6 = vsel %vm2178_vm3, %v2139_v57, %v2171_v10  ;;  %v2141_v14 = vmul.f32 %v3575_v60, %v4311_v3 }
 0x4ee   : > { %v3577_v11 = vpop.eup %3576  ;;  %v2242_v58 = vmul.f32 %v4316_v9, %v2204_v6  ;;  %v2203_v61 = vsel %vm2178_vm3, %v2138_v2, %v2170_v4 }
 0x4ef   : > { %v2241_v16 = vmul.f32 %v4316_v9, %v2203_v61  ;;  %v2206_v49 = vsel %vm2178_vm3, %v2141_v14, %v2173_v15  ;;  %v2140_v44 = vmul.f32 %v3577_v11, %v4311_v3 }
 0x4f0   : > { %2274 = vst [vmem:[%s4358_s0 + $0xc8] sm:$0xff] %v2242_v58  ;;  %v2244_v38 = vmul.f32 %v4316_v9, %v2206_v49 }
 0x4f1   : > { %2273 = vst [vmem:[%s4358_s0 + $0xc0] sm:$0xff] %v2241_v16  ;;  %v2205_v62 = vsel %vm2178_vm3, %v2140_v44, %v2172_v18  ;;  %v3579_v35 = vpop.eup %3578 }
 0x4f2   : > { %2276 = vst [vmem:[%s4358_s0 + $0xd8] sm:$0xff] %v2244_v38  ;;  %v2243_v21 = vmul.f32 %v4316_v9, %v2205_v62  ;;  %v3581_v22 = vpop.eup %3580  ;;  %v2143_v63 = vmul.f32 %v3579_v35, %v4311_v3 }
 0x4f3   : > { %v3583_v59 = vpop.eup %3582  ;;  %v2142_v36 = vmul.f32 %v3581_v22, %v4311_v3 }
 0x4f4   : > { %2275 = vst [vmem:[%s4358_s0 + $0xd0] sm:$0xff] %v2243_v21  ;;  %v2208_v28 = vsel %vm2178_vm3, %v2143_v63, %v2175_v23  ;;  %v2145_v46 = vmul.f32 %v3583_v59, %v4311_v3  ;;  %v3585_v33 = vpop.eup %3584 }
 0x4f5   : > { %v2246_v47 = vmul.f32 %v4316_v9, %v2208_v28  ;;  %v2207_v8 = vsel %vm2178_vm3, %v2142_v36, %v2174_v24  ;;  %v2144_v0 = vmul.f32 %v3585_v33, %v4311_v3 }
 0x4f6   : > { %v2245_v43 = vmul.f32 %v4316_v9, %v2207_v8  ;;  %v2210_v34 = vsel %vm2178_vm3, %v2145_v46, %v2177_v30 }
 0x4f7   : > { %2278 = vst [vmem:[%s4358_s0 + $0xe8] sm:$0xff] %v2246_v47  ;;  %v2248_v12 = vmul.f32 %v4316_v9, %v2210_v34  ;;  %v2209_v17 = vsel %vm2178_vm3, %v2144_v0, %v2176_v53 }
 0x4f8   : > { %2277 = vst [vmem:[%s4358_s0 + $0xe0] sm:$0xff] %v2245_v43  ;;  %v2247_v3 = vmul.f32 %v4316_v9, %v2209_v17 }
 0x4f9   : > { %2280 = vst [vmem:[%s4358_s0 + $0xf8] sm:$0xff] %v2248_v12 }
 0x4fa   : > { %2279 = vst [vmem:[%s4358_s0 + $0xf0] sm:$0xff] %v2247_v3 }
 0x4fb   : > { %3614 = shalt.err (!%p3611_p2)
}
 0x4fc   : > { %s3615_s15 = scalar_lea.hbm %s4600_s28, 4096  ;;  %s3619_s25 = scalar_lea.hbm %s4662_s12, 8192 }
 0x4fd   : > { %p3616_p3 = scmp.ne.s32.totalorder %s4600_s28, %s3615_s15  ;;  %p3620_p8 = scmp.lt.u32.totalorder %s4600_s28, %s4662_s12 }
 0x4fe   : > { %p3621_p10 = scmp.lt.u32.totalorder %s3619_s25, %s3615_s15  ;;  %p3623_p11 = scmp.lt.u32.totalorder %s3615_s15, %s4600_s28 }
 0x4ff   : > { %p3617_p4 = pnand %p3616_p3, %p3776_p5 }
 0x500   : > { %p3622_p9 = por %p3621_p10, %p3620_p8 }
 0x501   : > { %p3618_p7 = pneg %p3617_p4 }
 0x502   : > { %p3624_p12 = por %p3623_p11, %p3622_p9 }
 0x504   : > { %p3625_p13 = pnand %p3624_p12, %p3618_p7 }
 0x506   : > { %3628 = shalt.err (!%p3625_p13)
}
 0x507   : > { %s3671_s16 = smov 128   ;;  %s3672_s19 = smov 8  }
 0x508   : > { %3154 = dma.vmem_to_hbm [thread:$0]  (%p3776_p5), %s4602_s20, 4096, %s4600_s28, %s4609_s29, %s3671_s16, %s3671_s16, %s3672_s19  }
 0x509 PF: > { %p3166_p0 = scmp.ge.s32.totalorder %s3667_s24, 2  ;;  %s2310_s0 = sand.u32 1, %s3655_s21  }
 0x50a   : > { %s2311_s15 = scalar_lea.sflag [#allocation3], %s2310_s0 }
 0x50b   : > { %p3161_p1 = pnand %p3166_p0, %p3780_p6 }
 0x50d   : > { %3650 = dma.done.wait (!%p3161_p1), %s2311_s15, 4096  }
 0x50e   : > { %3652 = vsyncadd (!%p3161_p1), %s2311_s15, 4294963200  ;;  %p23_p2 = scmp.ge.s32.totalorder %s3763_s27, 4   ;;  %s4668_s21 = smov %s3659_s22 }
 0x50f   : > { %s4669_s22 = smov %s3663_s23  ;;  %s4670_s23 = smov %s3774_s30 }
 0x510   : > { %s4671_s24 = smov %s3763_s27  ;;  %25 = sbr.rel (!%p23_p2) target bundleno = 6 (0x6), region = 108 }
 0x517   :  { %2316 = vsyncpa [#allocation3], 1 }
 0x518   :  { %2318 = vsyncpa [#allocation3 + $0x1], 1 }
 0x519   :  { %2319 = vsyncpa [#allocation4], 1 }
 0x51a   :  { %2321 = vsyncpa [#allocation4 + $0x1], 1 }

</bundles_post_ra>
